<compile_context>
chip_gen: v7x
topology: tpu7x:2x2x1
jax: 0.10.0
libtpu: 0.0.40
codegen_flags: <defaults>
</compile_context>

<pallas_src>
import jax
import jax.numpy as jnp
import numpy as np
from jax import lax
from jax.experimental import pallas as pl
from jax.experimental.pallas import tpu as pltpu


def _make_kernel(c_in, c_hid, c_out, H, W, Nb):
    HW = H * W
    L = Nb * HW  # lanes per grid step (Nb images side by side)

    def rd(x, d):
        # result[i] = x[i + d] (cyclic over the merged slab; wrapped positions
        # are masked off by the caller). XLU lane rotation; data stays in vregs.
        return pltpu.roll(x, (-d) % L, 1)

    def kernel(x_ref, w1_ref, w2_ref, b2_ref, o_ref):
        # Geometry masks, lane-width only (1, L); broadcast against the planes.
        lane = lax.broadcasted_iota(jnp.int32, (1, L), 1)
        col = lane % W    # column within an image row
        pix = lane % HW   # flat pixel index within an image
        mw = {1: col < (W - 1), 2: col < (W - 2),
              -1: col >= 1, -2: col >= 2}
        mh = {1: pix < (HW - W), 2: pix < (HW - 2 * W),
              -1: pix >= W, -2: pix >= 2 * W}

        # ---- cv1: 1x1 conv as bf16 MXU matmul (BN scale folded into weights,
        # BN bias folded via the appended ones row of x), f32 acc, then ReLU.
        hid = jnp.dot(w1_ref[...], x_ref[...],
                      preferred_element_type=jnp.float32)
        hid = jnp.maximum(hid, 0.0)                       # (c_hid, L), f32

        def pool5(p):
            """Separable 5x5 / stride-1 / pad-2 max pool on flattened planes.

            Zero fill at masked taps is equivalent to -inf fill because every
            pooled plane is post-ReLU (>= 0)."""
            r = p
            for d in (1, 2, -1, -2):                      # W-direction taps
                r = jnp.maximum(r, jnp.where(mw[d], rd(p, d), 0.0))
            out = r
            for d in (1, 2, -1, -2):                      # H-direction taps
                out = jnp.maximum(out, jnp.where(mh[d], rd(r, d * W), 0.0))
            return out

        # ---- SPPF chain with cv2 fused per stage:
        #   acc += w2[stage] @ stage   (bf16 operands, f32 accumulation)
        acc = jnp.dot(w2_ref[0], hid.astype(jnp.bfloat16),
                      preferred_element_type=jnp.float32)
        cur = hid
        for k in range(1, 4):
            cur = pool5(cur)
            acc = acc + jnp.dot(w2_ref[k], cur.astype(jnp.bfloat16),
                                preferred_element_type=jnp.float32)

        # ---- cv2 epilogue: folded-BN bias + ReLU, one lane-dense store.
        o_ref[...] = jnp.maximum(acc + b2_ref[...], 0.0)

    return kernel


def _pick_block_images(N, HW, target_lanes=1024):
    """Images merged per grid step: a divisor of N targeting ~1k-lane slabs."""
    cap = max(1, target_lanes // HW)
    nb = 1
    for d in range(1, N + 1):
        if N % d == 0 and d <= cap:
            nb = d
    # Lane-dim blocks must be 128-aligned unless they span the full array.
    if nb != N and (nb * HW) % 128 != 0:
        nb = N
    return nb


def sim_sppf(x, w1, s1, b1, w2, s2, b2):
    N, c_in, H, W = x.shape
    c_hid = w1.shape[0]
    c_out = w2.shape[0]
    HW = H * W
    Nb = _pick_block_images(N, HW)
    L = Nb * HW

    # Fold BN scale into the 1x1 conv weights ((s*w) @ x == s * (w @ x)); fold
    # the cv1 bias into an extra weight column paired with a ones row in x.
    w1f = w1 * s1[:, None]                                         # (c_hid, c_in)
    w1a = jnp.concatenate([w1f, b1[:, None]], axis=1).astype(jnp.bfloat16)
    w2f = w2 * s2[:, None]                                         # (c_out, 4*c_hid)
    # Regroup cv2 weights per pool stage (cat order is [x, y1, y2, y3]).
    w2a = w2f.reshape(c_out, 4, c_hid).transpose(1, 0, 2).astype(jnp.bfloat16)
    b2f = b2.reshape(c_out, 1).astype(jnp.float32)

    # Lane-dense layout: images side by side on the lane axis, plus the ones
    # row carrying the cv1 bias. bf16 halves the HBM read of x.
    x2 = x.reshape(N, c_in, HW).transpose(1, 0, 2).reshape(c_in, N * HW)
    ones = jnp.ones((1, N * HW), x2.dtype)
    xm = jnp.concatenate([x2, ones], axis=0).astype(jnp.bfloat16)  # (c_in+1, N*HW)

    kernel = _make_kernel(c_in, c_hid, c_out, H, W, Nb)
    out2 = pl.pallas_call(
        kernel,
        out_shape=jax.ShapeDtypeStruct((c_out, N * HW), jnp.float32),
        grid=(N // Nb,),
        in_specs=[
            pl.BlockSpec((c_in + 1, L), lambda n: (0, n)),        # x (+ ones row)
            pl.BlockSpec((c_hid, c_in + 1), lambda n: (0, 0)),    # folded w1 | b1
            pl.BlockSpec((4, c_out, c_hid), lambda n: (0, 0, 0)), # folded w2 (per stage)
            pl.BlockSpec((c_out, 1), lambda n: (0, 0)),           # folded b2
        ],
        out_specs=pl.BlockSpec((c_out, L), lambda n: (0, n)),
        compiler_params=pltpu.CompilerParams(
            dimension_semantics=("parallel",),
            vmem_limit_bytes=32 * 1024 * 1024),
    )(xm, w1a, w2a, b2f)
    return out2.reshape(c_out, N, HW).transpose(1, 0, 2).reshape(N, c_out, H, W)


def _fold_bn(gamma, beta, mean, var, eps=1e-5):
    scale = gamma / jnp.sqrt(var + eps)
    bias = beta - mean * scale
    return scale.astype(jnp.float32), bias.astype(jnp.float32)


def _reference(x, w1, s1, b1, w2, s2, b2):
    """Pure-JAX f32 reference of the same forward pass (for verification)."""
    hp = lax.Precision.HIGHEST

    def cbr(t, w, s, b):
        y = jnp.einsum('oc,nchw->nohw', w, t, precision=hp)
        y = y * s[None, :, None, None] + b[None, :, None, None]
        return jnp.maximum(y, 0.0)

    def mp(t):
        return lax.reduce_window(
            t, -jnp.inf, lax.max,
            window_dimensions=(1, 1, 5, 5),
            window_strides=(1, 1, 1, 1),
            padding=((0, 0), (0, 0), (2, 2), (2, 2)))

    y = cbr(x, w1, s1, b1)
    y1 = mp(y)
    y2 = mp(y1)
    y3 = mp(y2)
    cat = jnp.concatenate([y, y1, y2, y3], axis=1)
    return cbr(cat, w2, s2, b2)


if __name__ == "__main__":
    # SimSPPF(in_channels=4, out_channels=8, kernel_size=5); c_ = 2
    N, C_IN, H, W = 2, 4, 16, 16
    C_OUT = 8
    C_HID = C_IN // 2

    key = jax.random.PRNGKey(0)
    ks = jax.random.split(key, 11)

    x = jax.random.normal(ks[0], (N, C_IN, H, W), dtype=jnp.float32)

    # cv1: conv weight (c_, C_IN) [1x1 kernel squeezed], BN params (c_,)
    w1 = (0.2 * jax.random.normal(ks[1], (C_HID, C_IN))).astype(jnp.float32)
    g1 = (1.0 + 0.1 * jax.random.normal(ks[2], (C_HID,))).astype(jnp.float32)
    be1 = (0.1 * jax.random.normal(ks[3], (C_HID,))).astype(jnp.float32)
    m1 = (0.05 * jax.random.normal(ks[4], (C_HID,))).astype(jnp.float32)
    v1 = (0.5 + jnp.abs(jax.random.normal(ks[5], (C_HID,)))).astype(jnp.float32)
    s1, b1 = _fold_bn(g1, be1, m1, v1)

    # cv2: conv weight (C_OUT, 4*c_), BN params (C_OUT,)
    w2 = (0.2 * jax.random.normal(ks[6], (C_OUT, 4 * C_HID))).astype(jnp.float32)
    g2 = (1.0 + 0.1 * jax.random.normal(ks[7], (C_OUT,))).astype(jnp.float32)
    be2 = (0.1 * jax.random.normal(ks[8], (C_OUT,))).astype(jnp.float32)
    m2 = (0.05 * jax.random.normal(ks[9], (C_OUT,))).astype(jnp.float32)
    v2 = (0.5 + jnp.abs(jax.random.normal(ks[10], (C_OUT,)))).astype(jnp.float32)
    s2, b2 = _fold_bn(g2, be2, m2, v2)

    out = jax.block_until_ready(sim_sppf(x, w1, s1, b1, w2, s2, b2))
    ref = jax.block_until_ready(_reference(x, w1, s1, b1, w2, s2, b2))
    # bf16 MXU operands (f32 accumulation) vs. f32 HIGHEST-precision reference:
    # allow bf16-level tolerance (structural bugs produce O(0.1+) errors).
    np.testing.assert_allclose(np.asarray(out), np.asarray(ref),
                               rtol=3e-2, atol=3e-2)
    print("KERNEL_OK")
</pallas_src>

<mosaic_0001>
module attributes {stable_mosaic.version = 11 : i64} {
  func.func @kernel(%arg0: i32, %arg1: memref<5x512xbf16, #tpu.memory_space<vmem>>, %arg2: memref<2x5xbf16, #tpu.memory_space<vmem>>, %arg3: memref<4x8x2xbf16, #tpu.memory_space<vmem>>, %arg4: memref<8x1xf32, #tpu.memory_space<vmem>>, %arg5: memref<8x512xf32, #tpu.memory_space<vmem>>) attributes {dimension_semantics = [#tpu.dimension_semantics<parallel>], iteration_bounds = array<i64: 1>, scalar_prefetch = 0 : i64, scratch_operands = 0 : i64, tpu.core_type = #tpu.core_type<tc>, window_params = [{transform_indices = @transform_0, window_bounds = array<i64: 5, 512>}, {pipeline_mode = #tpu.pipeline_mode<synchronous>, transform_indices = @transform_1, window_bounds = array<i64: 2, 5>}, {pipeline_mode = #tpu.pipeline_mode<synchronous>, transform_indices = @transform_2, window_bounds = array<i64: 4, 8, 2>}, {pipeline_mode = #tpu.pipeline_mode<synchronous>, transform_indices = @transform_3, window_bounds = array<i64: 8, 1>}, {transform_indices = @transform_4, window_bounds = array<i64: 8, 512>}]} {
    %0 = tpu.iota {dimensions = array<i32: 1>} : vector<1x512xi32>
    %c16_i32 = arith.constant 16 : i32
    %c0_i32 = arith.constant 0 : i32
    %1 = arith.cmpi eq, %c16_i32, %c0_i32 : i32
    %c1_i32 = arith.constant 1 : i32
    %2 = arith.select %1, %c1_i32, %c16_i32 : i32
    %3 = vector.broadcast %2 : i32 to vector<1x512xi32>
    %4 = arith.remsi %0, %3 : vector<1x512xi32>
    %c0_i32_0 = arith.constant 0 : i32
    %5 = vector.broadcast %c0_i32_0 : i32 to vector<1x512xi32>
    %6 = arith.cmpi ne, %4, %5 : vector<1x512xi32>
    %c0_i32_1 = arith.constant 0 : i32
    %7 = vector.broadcast %c0_i32_1 : i32 to vector<1x512xi32>
    %8 = arith.cmpi slt, %4, %7 : vector<1x512xi32>
    %c0_i32_2 = arith.constant 0 : i32
    %9 = arith.cmpi slt, %2, %c0_i32_2 : i32
    %10 = vector.broadcast %9 : i1 to vector<1x512xi1>
    %11 = vector.broadcast %10 : vector<1x512xi1> to vector<1x512xi1>
    %12 = arith.xori %8, %11 : vector<1x512xi1>
    %13 = arith.andi %12, %6 : vector<1x512xi1>
    %14 = vector.broadcast %2 : i32 to vector<1x512xi32>
    %15 = arith.addi %4, %14 : vector<1x512xi32>
    %16 = arith.select %13, %15, %4 : vector<1x512xi1>, vector<1x512xi32>
    %c256_i32 = arith.constant 256 : i32
    %c0_i32_3 = arith.constant 0 : i32
    %17 = arith.cmpi eq, %c256_i32, %c0_i32_3 : i32
    %c1_i32_4 = arith.constant 1 : i32
    %18 = arith.select %17, %c1_i32_4, %c256_i32 : i32
    %19 = vector.broadcast %18 : i32 to vector<1x512xi32>
    %20 = arith.remsi %0, %19 : vector<1x512xi32>
    %c0_i32_5 = arith.constant 0 : i32
    %21 = vector.broadcast %c0_i32_5 : i32 to vector<1x512xi32>
    %22 = arith.cmpi ne, %20, %21 : vector<1x512xi32>
    %c0_i32_6 = arith.constant 0 : i32
    %23 = vector.broadcast %c0_i32_6 : i32 to vector<1x512xi32>
    %24 = arith.cmpi slt, %20, %23 : vector<1x512xi32>
    %c0_i32_7 = arith.constant 0 : i32
    %25 = arith.cmpi slt, %18, %c0_i32_7 : i32
    %26 = vector.broadcast %25 : i1 to vector<1x512xi1>
    %27 = vector.broadcast %26 : vector<1x512xi1> to vector<1x512xi1>
    %28 = arith.xori %24, %27 : vector<1x512xi1>
    %29 = arith.andi %28, %22 : vector<1x512xi1>
    %30 = vector.broadcast %18 : i32 to vector<1x512xi32>
    %31 = arith.addi %20, %30 : vector<1x512xi32>
    %32 = arith.select %29, %31, %20 : vector<1x512xi1>, vector<1x512xi32>
    %c15_i32 = arith.constant 15 : i32
    %33 = vector.broadcast %c15_i32 : i32 to vector<1x512xi32>
    %34 = arith.cmpi slt, %16, %33 : vector<1x512xi32>
    %c14_i32 = arith.constant 14 : i32
    %35 = vector.broadcast %c14_i32 : i32 to vector<1x512xi32>
    %36 = arith.cmpi slt, %16, %35 : vector<1x512xi32>
    %c1_i32_8 = arith.constant 1 : i32
    %37 = vector.broadcast %c1_i32_8 : i32 to vector<1x512xi32>
    %38 = arith.cmpi sge, %16, %37 : vector<1x512xi32>
    %c2_i32 = arith.constant 2 : i32
    %39 = vector.broadcast %c2_i32 : i32 to vector<1x512xi32>
    %40 = arith.cmpi sge, %16, %39 : vector<1x512xi32>
    %c240_i32 = arith.constant 240 : i32
    %41 = vector.broadcast %c240_i32 : i32 to vector<1x512xi32>
    %42 = arith.cmpi slt, %32, %41 : vector<1x512xi32>
    %c224_i32 = arith.constant 224 : i32
    %43 = vector.broadcast %c224_i32 : i32 to vector<1x512xi32>
    %44 = arith.cmpi slt, %32, %43 : vector<1x512xi32>
    %c16_i32_9 = arith.constant 16 : i32
    %45 = vector.broadcast %c16_i32_9 : i32 to vector<1x512xi32>
    %46 = arith.cmpi sge, %32, %45 : vector<1x512xi32>
    %c32_i32 = arith.constant 32 : i32
    %47 = vector.broadcast %c32_i32 : i32 to vector<1x512xi32>
    %48 = arith.cmpi sge, %32, %47 : vector<1x512xi32>
    %c0 = arith.constant 0 : index
    %c0_10 = arith.constant 0 : index
    %49 = vector.load %arg2[%c0, %c0_10] : memref<2x5xbf16, #tpu.memory_space<vmem>>, vector<2x5xbf16>
    %c0_11 = arith.constant 0 : index
    %c0_12 = arith.constant 0 : index
    %50 = vector.load %arg1[%c0_11, %c0_12] : memref<5x512xbf16, #tpu.memory_space<vmem>>, vector<5x512xbf16>
    %cst = arith.constant dense<0.000000e+00> : vector<2x512xf32>
    %51 = tpu.matmul %49, %50, %cst {dimension_numbers = #tpu.dot_dimension_numbers<[1], [0], [0], [1], [0, 0, 1, 1], [], []>} : vector<2x5xbf16>, vector<5x512xbf16>, vector<2x512xf32> -> vector<2x512xf32>
    %cst_13 = arith.constant 0.000000e+00 : f32
    %52 = vector.broadcast %cst_13 : f32 to vector<2x512xf32>
    %53 = arith.maximumf %51, %52 : vector<2x512xf32>
    %c0_14 = arith.constant 0 : index
    %c0_15 = arith.constant 0 : index
    %c0_16 = arith.constant 0 : index
    %54 = vector.load %arg3[%c0_14, %c0_15, %c0_16] : memref<4x8x2xbf16, #tpu.memory_space<vmem>>, vector<1x8x2xbf16>
    %55 = vector.shape_cast %54 : vector<1x8x2xbf16> to vector<8x2xbf16>
    %56 = arith.truncf %53 : vector<2x512xf32> to vector<2x512xbf16>
    %cst_17 = arith.constant dense<0.000000e+00> : vector<8x512xf32>
    %57 = tpu.matmul %55, %56, %cst_17 {dimension_numbers = #tpu.dot_dimension_numbers<[1], [0], [0], [1], [0, 0, 1, 1], [], []>} : vector<8x2xbf16>, vector<2x512xbf16>, vector<8x512xf32> -> vector<8x512xf32>
    %c511_i32 = arith.constant 511 : i32
    %58 = tpu.dynamic_rotate %53 by %c511_i32 dim 1 : vector<2x512xf32>, i32 -> vector<2x512xf32>
    %cst_18 = arith.constant 0.000000e+00 : f32
    %59 = vector.shape_cast %34 : vector<1x512xi1> to vector<1x512xi1>
    %60 = vector.broadcast %59 : vector<1x512xi1> to vector<2x512xi1>
    %61 = vector.broadcast %cst_18 : f32 to vector<2x512xf32>
    %62 = arith.select %60, %58, %61 : vector<2x512xi1>, vector<2x512xf32>
    %63 = arith.maximumf %53, %62 : vector<2x512xf32>
    %c510_i32 = arith.constant 510 : i32
    %64 = tpu.dynamic_rotate %53 by %c510_i32 dim 1 : vector<2x512xf32>, i32 -> vector<2x512xf32>
    %cst_19 = arith.constant 0.000000e+00 : f32
    %65 = vector.shape_cast %36 : vector<1x512xi1> to vector<1x512xi1>
    %66 = vector.broadcast %65 : vector<1x512xi1> to vector<2x512xi1>
    %67 = vector.broadcast %cst_19 : f32 to vector<2x512xf32>
    %68 = arith.select %66, %64, %67 : vector<2x512xi1>, vector<2x512xf32>
    %69 = arith.maximumf %63, %68 : vector<2x512xf32>
    %c1_i32_20 = arith.constant 1 : i32
    %70 = tpu.dynamic_rotate %53 by %c1_i32_20 dim 1 : vector<2x512xf32>, i32 -> vector<2x512xf32>
    %cst_21 = arith.constant 0.000000e+00 : f32
    %71 = vector.shape_cast %38 : vector<1x512xi1> to vector<1x512xi1>
    %72 = vector.broadcast %71 : vector<1x512xi1> to vector<2x512xi1>
    %73 = vector.broadcast %cst_21 : f32 to vector<2x512xf32>
    %74 = arith.select %72, %70, %73 : vector<2x512xi1>, vector<2x512xf32>
    %75 = arith.maximumf %69, %74 : vector<2x512xf32>
    %c2_i32_22 = arith.constant 2 : i32
    %76 = tpu.dynamic_rotate %53 by %c2_i32_22 dim 1 : vector<2x512xf32>, i32 -> vector<2x512xf32>
    %cst_23 = arith.constant 0.000000e+00 : f32
    %77 = vector.shape_cast %40 : vector<1x512xi1> to vector<1x512xi1>
    %78 = vector.broadcast %77 : vector<1x512xi1> to vector<2x512xi1>
    %79 = vector.broadcast %cst_23 : f32 to vector<2x512xf32>
    %80 = arith.select %78, %76, %79 : vector<2x512xi1>, vector<2x512xf32>
    %81 = arith.maximumf %75, %80 : vector<2x512xf32>
    %c496_i32 = arith.constant 496 : i32
    %82 = tpu.dynamic_rotate %81 by %c496_i32 dim 1 : vector<2x512xf32>, i32 -> vector<2x512xf32>
    %cst_24 = arith.constant 0.000000e+00 : f32
    %83 = vector.shape_cast %42 : vector<1x512xi1> to vector<1x512xi1>
    %84 = vector.broadcast %83 : vector<1x512xi1> to vector<2x512xi1>
    %85 = vector.broadcast %cst_24 : f32 to vector<2x512xf32>
    %86 = arith.select %84, %82, %85 : vector<2x512xi1>, vector<2x512xf32>
    %87 = arith.maximumf %81, %86 : vector<2x512xf32>
    %c480_i32 = arith.constant 480 : i32
    %88 = tpu.dynamic_rotate %81 by %c480_i32 dim 1 : vector<2x512xf32>, i32 -> vector<2x512xf32>
    %cst_25 = arith.constant 0.000000e+00 : f32
    %89 = vector.shape_cast %44 : vector<1x512xi1> to vector<1x512xi1>
    %90 = vector.broadcast %89 : vector<1x512xi1> to vector<2x512xi1>
    %91 = vector.broadcast %cst_25 : f32 to vector<2x512xf32>
    %92 = arith.select %90, %88, %91 : vector<2x512xi1>, vector<2x512xf32>
    %93 = arith.maximumf %87, %92 : vector<2x512xf32>
    %c16_i32_26 = arith.constant 16 : i32
    %94 = tpu.dynamic_rotate %81 by %c16_i32_26 dim 1 : vector<2x512xf32>, i32 -> vector<2x512xf32>
    %cst_27 = arith.constant 0.000000e+00 : f32
    %95 = vector.shape_cast %46 : vector<1x512xi1> to vector<1x512xi1>
    %96 = vector.broadcast %95 : vector<1x512xi1> to vector<2x512xi1>
    %97 = vector.broadcast %cst_27 : f32 to vector<2x512xf32>
    %98 = arith.select %96, %94, %97 : vector<2x512xi1>, vector<2x512xf32>
    %99 = arith.maximumf %93, %98 : vector<2x512xf32>
    %c32_i32_28 = arith.constant 32 : i32
    %100 = tpu.dynamic_rotate %81 by %c32_i32_28 dim 1 : vector<2x512xf32>, i32 -> vector<2x512xf32>
    %cst_29 = arith.constant 0.000000e+00 : f32
    %101 = vector.shape_cast %48 : vector<1x512xi1> to vector<1x512xi1>
    %102 = vector.broadcast %101 : vector<1x512xi1> to vector<2x512xi1>
    %103 = vector.broadcast %cst_29 : f32 to vector<2x512xf32>
    %104 = arith.select %102, %100, %103 : vector<2x512xi1>, vector<2x512xf32>
    %105 = arith.maximumf %99, %104 : vector<2x512xf32>
    %c1 = arith.constant 1 : index
    %c0_30 = arith.constant 0 : index
    %c0_31 = arith.constant 0 : index
    %106 = vector.load %arg3[%c1, %c0_30, %c0_31] : memref<4x8x2xbf16, #tpu.memory_space<vmem>>, vector<1x8x2xbf16>
    %107 = vector.shape_cast %106 : vector<1x8x2xbf16> to vector<8x2xbf16>
    %108 = arith.truncf %105 : vector<2x512xf32> to vector<2x512xbf16>
    %cst_32 = arith.constant dense<0.000000e+00> : vector<8x512xf32>
    %109 = tpu.matmul %107, %108, %cst_32 {dimension_numbers = #tpu.dot_dimension_numbers<[1], [0], [0], [1], [0, 0, 1, 1], [], []>} : vector<8x2xbf16>, vector<2x512xbf16>, vector<8x512xf32> -> vector<8x512xf32>
    %110 = arith.addf %57, %109 : vector<8x512xf32>
    %c511_i32_33 = arith.constant 511 : i32
    %111 = tpu.dynamic_rotate %105 by %c511_i32_33 dim 1 : vector<2x512xf32>, i32 -> vector<2x512xf32>
    %cst_34 = arith.constant 0.000000e+00 : f32
    %112 = vector.shape_cast %34 : vector<1x512xi1> to vector<1x512xi1>
    %113 = vector.broadcast %112 : vector<1x512xi1> to vector<2x512xi1>
    %114 = vector.broadcast %cst_34 : f32 to vector<2x512xf32>
    %115 = arith.select %113, %111, %114 : vector<2x512xi1>, vector<2x512xf32>
    %116 = arith.maximumf %105, %115 : vector<2x512xf32>
    %c510_i32_35 = arith.constant 510 : i32
    %117 = tpu.dynamic_rotate %105 by %c510_i32_35 dim 1 : vector<2x512xf32>, i32 -> vector<2x512xf32>
    %cst_36 = arith.constant 0.000000e+00 : f32
    %118 = vector.shape_cast %36 : vector<1x512xi1> to vector<1x512xi1>
    %119 = vector.broadcast %118 : vector<1x512xi1> to vector<2x512xi1>
    %120 = vector.broadcast %cst_36 : f32 to vector<2x512xf32>
    %121 = arith.select %119, %117, %120 : vector<2x512xi1>, vector<2x512xf32>
    %122 = arith.maximumf %116, %121 : vector<2x512xf32>
    %c1_i32_37 = arith.constant 1 : i32
    %123 = tpu.dynamic_rotate %105 by %c1_i32_37 dim 1 : vector<2x512xf32>, i32 -> vector<2x512xf32>
    %cst_38 = arith.constant 0.000000e+00 : f32
    %124 = vector.shape_cast %38 : vector<1x512xi1> to vector<1x512xi1>
    %125 = vector.broadcast %124 : vector<1x512xi1> to vector<2x512xi1>
    %126 = vector.broadcast %cst_38 : f32 to vector<2x512xf32>
    %127 = arith.select %125, %123, %126 : vector<2x512xi1>, vector<2x512xf32>
    %128 = arith.maximumf %122, %127 : vector<2x512xf32>
    %c2_i32_39 = arith.constant 2 : i32
    %129 = tpu.dynamic_rotate %105 by %c2_i32_39 dim 1 : vector<2x512xf32>, i32 -> vector<2x512xf32>
    %cst_40 = arith.constant 0.000000e+00 : f32
    %130 = vector.shape_cast %40 : vector<1x512xi1> to vector<1x512xi1>
    %131 = vector.broadcast %130 : vector<1x512xi1> to vector<2x512xi1>
    %132 = vector.broadcast %cst_40 : f32 to vector<2x512xf32>
    %133 = arith.select %131, %129, %132 : vector<2x512xi1>, vector<2x512xf32>
    %134 = arith.maximumf %128, %133 : vector<2x512xf32>
    %c496_i32_41 = arith.constant 496 : i32
    %135 = tpu.dynamic_rotate %134 by %c496_i32_41 dim 1 : vector<2x512xf32>, i32 -> vector<2x512xf32>
    %cst_42 = arith.constant 0.000000e+00 : f32
    %136 = vector.shape_cast %42 : vector<1x512xi1> to vector<1x512xi1>
    %137 = vector.broadcast %136 : vector<1x512xi1> to vector<2x512xi1>
    %138 = vector.broadcast %cst_42 : f32 to vector<2x512xf32>
    %139 = arith.select %137, %135, %138 : vector<2x512xi1>, vector<2x512xf32>
    %140 = arith.maximumf %134, %139 : vector<2x512xf32>
    %c480_i32_43 = arith.constant 480 : i32
    %141 = tpu.dynamic_rotate %134 by %c480_i32_43 dim 1 : vector<2x512xf32>, i32 -> vector<2x512xf32>
    %cst_44 = arith.constant 0.000000e+00 : f32
    %142 = vector.shape_cast %44 : vector<1x512xi1> to vector<1x512xi1>
    %143 = vector.broadcast %142 : vector<1x512xi1> to vector<2x512xi1>
    %144 = vector.broadcast %cst_44 : f32 to vector<2x512xf32>
    %145 = arith.select %143, %141, %144 : vector<2x512xi1>, vector<2x512xf32>
    %146 = arith.maximumf %140, %145 : vector<2x512xf32>
    %c16_i32_45 = arith.constant 16 : i32
    %147 = tpu.dynamic_rotate %134 by %c16_i32_45 dim 1 : vector<2x512xf32>, i32 -> vector<2x512xf32>
    %cst_46 = arith.constant 0.000000e+00 : f32
    %148 = vector.shape_cast %46 : vector<1x512xi1> to vector<1x512xi1>
    %149 = vector.broadcast %148 : vector<1x512xi1> to vector<2x512xi1>
    %150 = vector.broadcast %cst_46 : f32 to vector<2x512xf32>
    %151 = arith.select %149, %147, %150 : vector<2x512xi1>, vector<2x512xf32>
    %152 = arith.maximumf %146, %151 : vector<2x512xf32>
    %c32_i32_47 = arith.constant 32 : i32
    %153 = tpu.dynamic_rotate %134 by %c32_i32_47 dim 1 : vector<2x512xf32>, i32 -> vector<2x512xf32>
    %cst_48 = arith.constant 0.000000e+00 : f32
    %154 = vector.shape_cast %48 : vector<1x512xi1> to vector<1x512xi1>
    %155 = vector.broadcast %154 : vector<1x512xi1> to vector<2x512xi1>
    %156 = vector.broadcast %cst_48 : f32 to vector<2x512xf32>
    %157 = arith.select %155, %153, %156 : vector<2x512xi1>, vector<2x512xf32>
    %158 = arith.maximumf %152, %157 : vector<2x512xf32>
    %c2 = arith.constant 2 : index
    %c0_49 = arith.constant 0 : index
    %c0_50 = arith.constant 0 : index
    %159 = vector.load %arg3[%c2, %c0_49, %c0_50] : memref<4x8x2xbf16, #tpu.memory_space<vmem>>, vector<1x8x2xbf16>
    %160 = vector.shape_cast %159 : vector<1x8x2xbf16> to vector<8x2xbf16>
    %161 = arith.truncf %158 : vector<2x512xf32> to vector<2x512xbf16>
    %cst_51 = arith.constant dense<0.000000e+00> : vector<8x512xf32>
    %162 = tpu.matmul %160, %161, %cst_51 {dimension_numbers = #tpu.dot_dimension_numbers<[1], [0], [0], [1], [0, 0, 1, 1], [], []>} : vector<8x2xbf16>, vector<2x512xbf16>, vector<8x512xf32> -> vector<8x512xf32>
    %163 = arith.addf %110, %162 : vector<8x512xf32>
    %c511_i32_52 = arith.constant 511 : i32
    %164 = tpu.dynamic_rotate %158 by %c511_i32_52 dim 1 : vector<2x512xf32>, i32 -> vector<2x512xf32>
    %cst_53 = arith.constant 0.000000e+00 : f32
    %165 = vector.shape_cast %34 : vector<1x512xi1> to vector<1x512xi1>
    %166 = vector.broadcast %165 : vector<1x512xi1> to vector<2x512xi1>
    %167 = vector.broadcast %cst_53 : f32 to vector<2x512xf32>
    %168 = arith.select %166, %164, %167 : vector<2x512xi1>, vector<2x512xf32>
    %169 = arith.maximumf %158, %168 : vector<2x512xf32>
    %c510_i32_54 = arith.constant 510 : i32
    %170 = tpu.dynamic_rotate %158 by %c510_i32_54 dim 1 : vector<2x512xf32>, i32 -> vector<2x512xf32>
    %cst_55 = arith.constant 0.000000e+00 : f32
    %171 = vector.shape_cast %36 : vector<1x512xi1> to vector<1x512xi1>
    %172 = vector.broadcast %171 : vector<1x512xi1> to vector<2x512xi1>
    %173 = vector.broadcast %cst_55 : f32 to vector<2x512xf32>
    %174 = arith.select %172, %170, %173 : vector<2x512xi1>, vector<2x512xf32>
    %175 = arith.maximumf %169, %174 : vector<2x512xf32>
    %c1_i32_56 = arith.constant 1 : i32
    %176 = tpu.dynamic_rotate %158 by %c1_i32_56 dim 1 : vector<2x512xf32>, i32 -> vector<2x512xf32>
    %cst_57 = arith.constant 0.000000e+00 : f32
    %177 = vector.shape_cast %38 : vector<1x512xi1> to vector<1x512xi1>
    %178 = vector.broadcast %177 : vector<1x512xi1> to vector<2x512xi1>
    %179 = vector.broadcast %cst_57 : f32 to vector<2x512xf32>
    %180 = arith.select %178, %176, %179 : vector<2x512xi1>, vector<2x512xf32>
    %181 = arith.maximumf %175, %180 : vector<2x512xf32>
    %c2_i32_58 = arith.constant 2 : i32
    %182 = tpu.dynamic_rotate %158 by %c2_i32_58 dim 1 : vector<2x512xf32>, i32 -> vector<2x512xf32>
    %cst_59 = arith.constant 0.000000e+00 : f32
    %183 = vector.shape_cast %40 : vector<1x512xi1> to vector<1x512xi1>
    %184 = vector.broadcast %183 : vector<1x512xi1> to vector<2x512xi1>
    %185 = vector.broadcast %cst_59 : f32 to vector<2x512xf32>
    %186 = arith.select %184, %182, %185 : vector<2x512xi1>, vector<2x512xf32>
    %187 = arith.maximumf %181, %186 : vector<2x512xf32>
    %c496_i32_60 = arith.constant 496 : i32
    %188 = tpu.dynamic_rotate %187 by %c496_i32_60 dim 1 : vector<2x512xf32>, i32 -> vector<2x512xf32>
    %cst_61 = arith.constant 0.000000e+00 : f32
    %189 = vector.shape_cast %42 : vector<1x512xi1> to vector<1x512xi1>
    %190 = vector.broadcast %189 : vector<1x512xi1> to vector<2x512xi1>
    %191 = vector.broadcast %cst_61 : f32 to vector<2x512xf32>
    %192 = arith.select %190, %188, %191 : vector<2x512xi1>, vector<2x512xf32>
    %193 = arith.maximumf %187, %192 : vector<2x512xf32>
    %c480_i32_62 = arith.constant 480 : i32
    %194 = tpu.dynamic_rotate %187 by %c480_i32_62 dim 1 : vector<2x512xf32>, i32 -> vector<2x512xf32>
    %cst_63 = arith.constant 0.000000e+00 : f32
    %195 = vector.shape_cast %44 : vector<1x512xi1> to vector<1x512xi1>
    %196 = vector.broadcast %195 : vector<1x512xi1> to vector<2x512xi1>
    %197 = vector.broadcast %cst_63 : f32 to vector<2x512xf32>
    %198 = arith.select %196, %194, %197 : vector<2x512xi1>, vector<2x512xf32>
    %199 = arith.maximumf %193, %198 : vector<2x512xf32>
    %c16_i32_64 = arith.constant 16 : i32
    %200 = tpu.dynamic_rotate %187 by %c16_i32_64 dim 1 : vector<2x512xf32>, i32 -> vector<2x512xf32>
    %cst_65 = arith.constant 0.000000e+00 : f32
    %201 = vector.shape_cast %46 : vector<1x512xi1> to vector<1x512xi1>
    %202 = vector.broadcast %201 : vector<1x512xi1> to vector<2x512xi1>
    %203 = vector.broadcast %cst_65 : f32 to vector<2x512xf32>
    %204 = arith.select %202, %200, %203 : vector<2x512xi1>, vector<2x512xf32>
    %205 = arith.maximumf %199, %204 : vector<2x512xf32>
    %c32_i32_66 = arith.constant 32 : i32
    %206 = tpu.dynamic_rotate %187 by %c32_i32_66 dim 1 : vector<2x512xf32>, i32 -> vector<2x512xf32>
    %cst_67 = arith.constant 0.000000e+00 : f32
    %207 = vector.shape_cast %48 : vector<1x512xi1> to vector<1x512xi1>
    %208 = vector.broadcast %207 : vector<1x512xi1> to vector<2x512xi1>
    %209 = vector.broadcast %cst_67 : f32 to vector<2x512xf32>
    %210 = arith.select %208, %206, %209 : vector<2x512xi1>, vector<2x512xf32>
    %211 = arith.maximumf %205, %210 : vector<2x512xf32>
    %c3 = arith.constant 3 : index
    %c0_68 = arith.constant 0 : index
    %c0_69 = arith.constant 0 : index
    %212 = vector.load %arg3[%c3, %c0_68, %c0_69] : memref<4x8x2xbf16, #tpu.memory_space<vmem>>, vector<1x8x2xbf16>
    %213 = vector.shape_cast %212 : vector<1x8x2xbf16> to vector<8x2xbf16>
    %214 = arith.truncf %211 : vector<2x512xf32> to vector<2x512xbf16>
    %cst_70 = arith.constant dense<0.000000e+00> : vector<8x512xf32>
    %215 = tpu.matmul %213, %214, %cst_70 {dimension_numbers = #tpu.dot_dimension_numbers<[1], [0], [0], [1], [0, 0, 1, 1], [], []>} : vector<8x2xbf16>, vector<2x512xbf16>, vector<8x512xf32> -> vector<8x512xf32>
    %216 = arith.addf %163, %215 : vector<8x512xf32>
    %c0_71 = arith.constant 0 : index
    %c0_72 = arith.constant 0 : index
    %217 = vector.load %arg4[%c0_71, %c0_72] : memref<8x1xf32, #tpu.memory_space<vmem>>, vector<8x1xf32>
    %218 = vector.broadcast %217 : vector<8x1xf32> to vector<8x512xf32>
    %219 = arith.addf %216, %218 : vector<8x512xf32>
    %cst_73 = arith.constant 0.000000e+00 : f32
    %220 = vector.broadcast %cst_73 : f32 to vector<8x512xf32>
    %221 = arith.maximumf %219, %220 : vector<8x512xf32>
    %c0_74 = arith.constant 0 : index
    %c0_75 = arith.constant 0 : index
    %222 = vector.load %arg5[%c0_74, %c0_75] : memref<8x512xf32, #tpu.memory_space<vmem>>, vector<8x512xf32>
    tpu.vector_store %arg5[%c0_74, %c0_75], %221 {strides = array<i32>} : memref<8x512xf32, #tpu.memory_space<vmem>>, vector<8x512xf32>,
    return
  }
  func.func @transform_0(%arg0: i32) -> (i32, i32) {
    %c0_i32 = arith.constant 0 : i32
    %c0_i32_0 = arith.constant 0 : i32
    return %c0_i32, %arg0 : i32, i32
  }
  func.func @transform_1(%arg0: i32) -> (i32, i32) {
    %c0_i32 = arith.constant 0 : i32
    %c0_i32_0 = arith.constant 0 : i32
    %c0_i32_1 = arith.constant 0 : i32
    return %c0_i32, %c0_i32_0 : i32, i32
  }
  func.func @transform_2(%arg0: i32) -> (i32, i32, i32) {
    %c0_i32 = arith.constant 0 : i32
    %c0_i32_0 = arith.constant 0 : i32
    %c0_i32_1 = arith.constant 0 : i32
    %c0_i32_2 = arith.constant 0 : i32
    return %c0_i32, %c0_i32_0, %c0_i32_1 : i32, i32, i32
  }
  func.func @transform_3(%arg0: i32) -> (i32, i32) {
    %c0_i32 = arith.constant 0 : i32
    %c0_i32_0 = arith.constant 0 : i32
    %c0_i32_1 = arith.constant 0 : i32
    return %c0_i32, %c0_i32_0 : i32, i32
  }
  func.func @transform_4(%arg0: i32) -> (i32, i32) {
    %c0_i32 = arith.constant 0 : i32
    %c0_i32_0 = arith.constant 0 : i32
    return %c0_i32, %arg0 : i32, i32
  }
}

</mosaic_0001>

<bundles_post_ra>
// kernel: tpu_custom_call.1
= control target key start
LH: loop header
LB: loop body
LE: loop exit
PB: predicated region body
PF: predicated region fallthrough
CT: control target
= control target key end

     0   :  { %vm169_vm0 = vcmask 1041408   ;;  %vm170_vm1 = vcmask 1042432   ;;  %v1581_v2 = vmov 65535   ;;  %v1582_v6 = vmov 0   ;;  %s2259_s0 = inlined_call_operand.vmem [shape: bf16[5,512], index: 0, kind: input, shape index: {}]   ;;  %s2260_s1 = inlined_call_operand.vmem [shape: bf16[2,5], index: 1, kind: input, shape index: {}]   ;;  %s2261_s2 = inlined_call_operand.vmem [shape: bf16[4,8,2], index: 2, kind: input, shape index: {}]   ;;  %s2262_s3 = inlined_call_operand.vmem [shape: f32[8,1], index: 3, kind: input, shape index: {}]   ;;  %s2263_s4 = inlined_call_operand.hbm [shape: f32[8,512], index: 4, kind: output, shape index: {}]  }
   0x1   :  { %v153_v0 = vld [vmem:[%s2259_s0] sm:$0x77]  ;;  %v171_v3 = vsel %vm169_vm0, 4294967295, %v1581_v2  ;;  %v154_v5 = vld [vmem:[%s2259_s0 + $0x8] sm:$0x77]  ;;  %217 = vmatprep.mubr.bf16.mxu0 %v1582_v6  ;;  %258 = vmatprep.mubr.bf16.mxu1 %v1582_v6 }
   0x2   :  { %v1277_v1 = vcombine.high %v153_v0, %v153_v0  ;;  %v1276_v4 = vcombine.low %v153_v0, %v153_v0  ;;  %v172_v7 = vsel %vm170_vm1, %v171_v3, 0  ;;  %v1279_v8 = vcombine.high %v154_v5, %v154_v5  ;;  %1552 = vset.pattern.permute.xlu0 %v1582_v6 }
   0x3   :  { %v1278_v9 = vcombine.low %v154_v5, %v154_v5 }
   0x4   :  { %9 = vsyncpa [#allocation3], 0  ;;  %v177_v10 = vand.u32 %v1277_v1, %v172_v7  ;;  %v174_v11 = vand.u32 %v1276_v4, %v172_v7  ;;  %v183_v12 = vand.u32 %v1279_v8, %v172_v7  ;;  %v152_v14 = vld [vmem:[%s2260_s1] sm:$0x1]  ;;  %vm165_vm2 = vcmask 39936   ;;  %s1583_s1 = smov 126  }
   0x5   :  { %v180_v13 = vand.u32 %v1278_v9, %v172_v7  ;;  %s1584_s20 = smov 127   ;;  %s1585_s21 = smov 1   ;;  %v19_v29 = vlaneseq }
   0x6   :  { %185 = vmatprep.subr.bf16.mxu0 %v177_v10  ;;  %226 = vmatprep.subr.bf16.mxu1 %v183_v12  ;;  %s1586_s22 = smov 2   ;;  %s1587_s23 = smov 112  }
   0x7   :  { %186 = vmatpush1.bf16.msra.mxu0 %v174_v11  ;;  %227 = vmatpush1.bf16.msra.mxu1 %v180_v13  ;;  %v1651_v30 = vand.u32 127, %v19_v29  ;;  %s1588_s24 = smov 96   ;;  %s1589_s25 = smov 16  }
   0x8   :  { %s1590_s26 = smov 32  }
   0x9   :  { %v1654_v31 = vadd.s32 128, %v1651_v30  ;;  %v1657_v32 = vadd.s32 256, %v1651_v30  ;;  %v1660_v33 = vadd.s32 384, %v1651_v30  ;;  %v1663_v34 = vand.u32 15, %v1651_v30 }
   0xa   :  { %1280 = vmatmul.mubr.msk.bf16.vlgmr.msra.gmra.mrb[0].mxu0 %vm165_vm2, %v152_v14  ;;  %1281 = vmatmul.mubr.msk.bf16.vlgmr.msra.gmra.mrb[0].mxu1 %vm165_vm2, %v152_v14  ;;  %vm2284_vm3 = vcmp.lt.s32.totalorder %v1651_v30, 126  ;;  %vm2287_vm5 = vcmp.lt.s32.totalorder %v1651_v30, 127  ;;  %vm2276_vm14 = vcmp.lt.s32.totalorder %v1651_v30, 1  ;;  %vm2272_vm2 = vcmp.lt.s32.totalorder %v1651_v30, 2 }
   0xb   :  { %563 = vmatprep.mubr.bf16.mxu0 %v1582_v6  ;;  %604 = vmatprep.mubr.bf16.mxu1 %v1582_v6  ;;  %v1666_v35 = vand.u32 15, %v1654_v31  ;;  %v1669_v36 = vand.u32 15, %v1657_v32  ;;  %v1672_v37 = vand.u32 15, %v1660_v33  ;;  %vm2265_vm4 = vcmp.lt.s32.totalorder %v1663_v34, 15 }
   0xc   :  { %vm2264_vm6 = vcmp.lt.s32.totalorder %v1663_v34, 14  ;;  %vm2274_vm15 = vcmp.ge.s32.totalorder %v1663_v34, 1 }
   0xd   :  { %vm2277_vm7 = vcmp.lt.s32.totalorder %v1666_v35, 14  ;;  %vm2278_vm8 = vcmp.lt.s32.totalorder %v1669_v36, 14  ;;  %vm2266_vm9 = vcmp.lt.s32.totalorder %v1672_v37, 14  ;;  %vm2285_vm10 = vcmp.lt.s32.totalorder %v1666_v35, 15 }
   0xe   :  { %vm2286_vm11 = vcmp.lt.s32.totalorder %v1669_v36, 15  ;;  %vm2283_vm12 = vcmp.lt.s32.totalorder %v1672_v37, 15  ;;  %vm2267_vm13 = vcmp.ge.s32.totalorder %v1672_v37, 1  ;;  %vm2273_vm0 = vcmp.ge.s32.totalorder %v1666_v35, 1 }
   0xf   :  { %vm2275_vm1 = vcmp.ge.s32.totalorder %v1669_v36, 1 }
  0xdd   :  { %v219_v15 = vpop.f32.mrb[0].mxu0  ;;  %v260_v18 = vpop.f32.mrb[0].mxu1 }
  0xde   :  { %v1631_v16 = vmax.f32 %v219_v15, 0.0  ;;  %v221_v17 = vpop.f32.mrb[1].mxu0  ;;  %v1635_v20 = vmax.f32 %v260_v18, 0.0  ;;  %v262_v22 = vpop.f32.mrb[1].mxu1 }
  0xdf   :  { %v1633_v19 = vmax.f32 %v221_v17, 0.0  ;;  %v223_v21 = vpop.f32.mrb[2].mxu0  ;;  %v1637_v23 = vmax.f32 %v262_v22, 0.0  ;;  %v264_v25 = vpop.f32.mrb[2].mxu1 }
  0xe0   :  { %v224_v24 = vpop.f32.mrb[3].mxu0  ;;  %v265_v26 = vpop.f32.mrb[3].mxu1 }
  0xe1   :  { %v1322_v27 = vpack.i.bf16 %v1633_v19, %v1631_v16  ;;  %v1327_v28 = vpack.i.bf16 %v1637_v23, %v1635_v20 }
  0xe3   :  { %1323 = vrot.lane.b32.xlu1 %v1322_v27, %s1583_s1  ;;  %1313 = vrot.lane.b32.xlu0 %v1322_v27, %s1584_s20 }
  0xe7   :  { %1328 = vrot.lane.b32.xlu1 %v1327_v28, %s1583_s1  ;;  %1318 = vrot.lane.b32.xlu0 %v1327_v28, %s1584_s20 }
  0xeb   :  { %1338 = vrot.lane.b32.xlu1 %v1327_v28, %s1585_s21  ;;  %1333 = vrot.lane.b32.xlu0 %v1322_v27, %s1585_s21 }
  0xef   :  { %1348 = vrot.lane.b32.xlu1 %v1327_v28, %s1586_s22  ;;  %1343 = vrot.lane.b32.xlu0 %v1322_v27, %s1586_s22 }
 0x155   :  { %v1324_v38 = vpop.permute.xlu1 %1323  ;;  %v1314_v39 = vpop.permute.xlu0 %1313 }
 0x156   :  { %v1326_v40 = vunpack.i.h.bf16 %v1324_v38  ;;  %v1325_v41 = vunpack.i.l.bf16 %v1324_v38  ;;  %v1316_v42 = vunpack.i.h.bf16 %v1314_v39  ;;  %v1315_v43 = vunpack.i.l.bf16 %v1314_v39 }
 0x158   :  { %v287_v44 = vsel %vm2287_vm5, %v1315_v43, %v1316_v42  ;;  %v316_v45 = vsel %vm2284_vm3, %v1325_v41, %v1326_v40 }
 0x159   :  { %v297_v46 = vsel %vm2265_vm4, %v287_v44, 0.0  ;;  %v1329_v47 = vpop.permute.xlu1 %1328  ;;  %v1319_v48 = vpop.permute.xlu0 %1318  ;;  %v326_v53 = vsel %vm2264_vm6, %v316_v45, 0.0  ;;  %vm2271_vm6 = vcmp.ge.s32.totalorder %v1672_v37, 2  ;;  %vm2269_vm4 = vcmp.ge.s32.totalorder %v1663_v34, 2 }
 0x15a   :  { %v1331_v49 = vunpack.i.h.bf16 %v1329_v47  ;;  %v1330_v50 = vunpack.i.l.bf16 %v1329_v47  ;;  %v1321_v51 = vunpack.i.h.bf16 %v1319_v48  ;;  %v1320_v52 = vunpack.i.l.bf16 %v1319_v48 }
 0x15b   :  { %v301_v54 = vmax.f32 %v1631_v16, %v297_v46 }
 0x15c   :  { %v288_v55 = vsel %vm2287_vm5, %v1321_v51, %v1315_v43  ;;  %v314_v56 = vsel %vm2284_vm3, %v1330_v50, %v1331_v49  ;;  %v315_v57 = vsel %vm2284_vm3, %v1326_v40, %v1330_v50  ;;  %v317_v58 = vsel %vm2284_vm3, %v1331_v49, %v1325_v41 }
 0x15d   :  { %v285_v59 = vsel %vm2287_vm5, %v1320_v52, %v1321_v51  ;;  %v1339_v60 = vpop.permute.xlu1 %1338  ;;  %v1334_v61 = vpop.permute.xlu0 %1333  ;;  %v286_v62 = vsel %vm2287_vm5, %v1316_v42, %v1320_v52  ;;  %v300_v0 = vsel %vm2283_vm12, %v288_v55, 0.0  ;;  %v329_v7 = vsel %vm2266_vm9, %v317_v58, 0.0 }
 0x15e   :  { %v299_v63 = vsel %vm2286_vm11, %v285_v59, 0.0  ;;  %v1341_v1 = vunpack.i.h.bf16 %v1339_v60  ;;  %v298_v2 = vsel %vm2285_vm10, %v286_v62, 0.0  ;;  %v304_v4 = vmax.f32 %v1637_v23, %v300_v0 }
 0x15f   :  { %v303_v3 = vmax.f32 %v1635_v20, %v299_v63  ;;  %v1340_v5 = vunpack.i.l.bf16 %v1339_v60  ;;  %v302_v8 = vmax.f32 %v1633_v19, %v298_v2  ;;  %v1336_v9 = vunpack.i.h.bf16 %v1334_v61 }
 0x160   :  { %v1335_v10 = vunpack.i.l.bf16 %v1334_v61  ;;  %v327_v11 = vsel %vm2277_vm7, %v315_v57, 0.0  ;;  %v328_v12 = vsel %vm2278_vm8, %v314_v56, 0.0  ;;  %v333_v13 = vmax.f32 %v304_v4, %v329_v7 }
 0x161   :  { %v343_v14 = vsel %vm2276_vm14, %v1340_v5, %v1341_v1  ;;  %v1349_v15 = vpop.permute.xlu1 %1348  ;;  %v331_v17 = vmax.f32 %v302_v8, %v327_v11  ;;  %v332_v18 = vmax.f32 %v303_v3, %v328_v12  ;;  %v344_v21 = vsel %vm2276_vm14, %v1336_v9, %v1340_v5  ;;  %v1344_v24 = vpop.permute.xlu0 %1343 }
 0x162   :  { %v345_v22 = vsel %vm2276_vm14, %v1335_v10, %v1336_v9  ;;  %v358_v25 = vsel %vm2267_vm13, %v343_v14, 0.0  ;;  %v346_v26 = vsel %vm2276_vm14, %v1341_v1, %v1335_v10  ;;  %v357_v28 = vsel %vm2275_vm1, %v344_v21, 0.0 }
 0x163   :  { %v356_v27 = vsel %vm2273_vm0, %v345_v22, 0.0  ;;  %v330_v29 = vmax.f32 %v301_v54, %v326_v53  ;;  %v355_v38 = vsel %vm2274_vm15, %v346_v26, 0.0  ;;  %v1351_v39 = vunpack.i.h.bf16 %v1349_v15 }
 0x164   :  { %vm2268_vm9 = vcmp.ge.s32.totalorder %v1666_v35, 2  ;;  %v1350_v40 = vunpack.i.l.bf16 %v1349_v15  ;;  %v1346_v41 = vunpack.i.h.bf16 %v1344_v24  ;;  %v1345_v42 = vunpack.i.l.bf16 %v1344_v24 }
 0x165   :  { %vm2270_vm13 = vcmp.ge.s32.totalorder %v1669_v36, 2  ;;  %v362_v43 = vmax.f32 %v333_v13, %v358_v25  ;;  %v359_v44 = vmax.f32 %v330_v29, %v355_v38  ;;  %v360_v45 = vmax.f32 %v331_v17, %v356_v27  ;;  %v1296_v38 = vld [vmem:[%s2261_s2 + $0xc] sm:$0xf] }
 0x166   :  { %v361_v46 = vmax.f32 %v332_v18, %v357_v28  ;;  %v372_v47 = vsel %vm2272_vm2, %v1350_v40, %v1351_v39  ;;  %v373_v48 = vsel %vm2272_vm2, %v1346_v41, %v1350_v40  ;;  %v374_v49 = vsel %vm2272_vm2, %v1345_v42, %v1346_v41 }
 0x167   :  { %v375_v50 = vsel %vm2272_vm2, %v1351_v39, %v1345_v42  ;;  %v387_v51 = vsel %vm2271_vm6, %v372_v47, 0.0  ;;  %v385_v53 = vsel %vm2268_vm9, %v374_v49, 0.0  ;;  %v386_v54 = vsel %vm2270_vm13, %v373_v48, 0.0 }
 0x168   :  { %v384_v52 = vsel %vm2269_vm4, %v375_v50, 0.0  ;;  %v391_v55 = vmax.f32 %v362_v43, %v387_v51  ;;  %v389_v57 = vmax.f32 %v360_v45, %v385_v53  ;;  %v1764_v58 = vmax.f32 %v361_v46, %v386_v54 }
 0x169   :  { %v1762_v56 = vmax.f32 %v359_v44, %v384_v52  ;;  %v83_v61 = vand.u32 255, %v1654_v31  ;;  %vm2288_vm9 = vcmp.lt.s32.totalorder %v1651_v30, 112  ;;  %v97_v63 = vand.u32 255, %v1660_v33 }
 0x16a   :  { %v1357_v59 = vpack.i.bf16 %v391_v55, %v1764_v58  ;;  %v76_v7 = vand.u32 255, %v1651_v30  ;;  %v90_v8 = vand.u32 255, %v1657_v32  ;;  %vm2279_vm6 = vcmp.lt.s32.totalorder %v1651_v30, 96 }
 0x16b   :  { %v1352_v60 = vpack.i.bf16 %v389_v57, %v1762_v56  ;;  %vm1779_vm4 = vcmp.lt.s32.totalorder %v83_v61, 240  ;;  %vm1785_vm13 = vcmp.lt.s32.totalorder %v97_v63, 240  ;;  %vm1794_vm2 = vcmp.lt.s32.totalorder %v83_v61, 224 }
 0x16c   :  { %1358 = vrot.lane.b32.xlu1 %v1357_v59, %s1587_s23  ;;  %vm1798_vm0 = vcmp.lt.s32.totalorder %v97_v63, 224  ;;  %vm2280_vm15 = vcmp.lt.s32.totalorder %v1651_v30, 16  ;;  %vm2281_vm1 = vcmp.lt.s32.totalorder %v1651_v30, 32  ;;  %vm1808_vm14 = vcmp.ge.s32.totalorder %v76_v7, 16 }
 0x16d   :  { %1353 = vrot.lane.b32.xlu0 %v1352_v60, %s1587_s23  ;;  %vm1812_vm7 = vcmp.ge.s32.totalorder %v90_v8, 16  ;;  %vm1822_vm8 = vcmp.ge.s32.totalorder %v76_v7, 32 }
 0x170   :  { %1368 = vrot.lane.b32.xlu1 %v1357_v59, %s1588_s24 }
 0x171   :  { %1363 = vrot.lane.b32.xlu0 %v1352_v60, %s1588_s24 }
 0x174   :  { %1378 = vrot.lane.b32.xlu1 %v1357_v59, %s1589_s25 }
 0x175   :  { %1373 = vrot.lane.b32.xlu0 %v1352_v60, %s1589_s25 }
 0x178   :  { %1388 = vrot.lane.b32.xlu1 %v1357_v59, %s1590_s26 }
 0x179   :  { %1383 = vrot.lane.b32.xlu0 %v1352_v60, %s1590_s26 }
 0x1de   :  { %v1359_v62 = vpop.permute.xlu1 %1358 }
 0x1df   :  { %v1354_v0 = vpop.permute.xlu0 %1353  ;;  %v1361_v1 = vunpack.i.h.bf16 %v1359_v62  ;;  %v1360_v2 = vunpack.i.l.bf16 %v1359_v62 }
 0x1e0   :  { %v1356_v3 = vunpack.i.h.bf16 %v1354_v0  ;;  %v1355_v4 = vunpack.i.l.bf16 %v1354_v0 }
 0x1e1   :  { %v401_v25 = vsel %vm2288_vm9, %v1360_v2, %v1361_v1 }
 0x1e2   :  { %v402_v33 = vsel %vm2288_vm9, %v1356_v3, %v1360_v2  ;;  %v404_v9 = vsel %vm2288_vm9, %v1361_v1, %v1355_v4  ;;  %v1369_v10 = vpop.permute.xlu1 %1368  ;;  %v403_v39 = vsel %vm2288_vm9, %v1355_v4, %v1356_v3  ;;  %v419_v47 = vmax.f32 %v1764_v58, %v401_v25 }
 0x1e3   :  { %v1364_v11 = vpop.permute.xlu0 %1363  ;;  %v1371_v12 = vunpack.i.h.bf16 %v1369_v10  ;;  %v1370_v13 = vunpack.i.l.bf16 %v1369_v10  ;;  %v414_v18 = vsel %vm1779_vm4, %v402_v33, 0.0  ;;  %v416_v21 = vsel %vm1785_vm13, %v404_v9, 0.0 }
 0x1e4   :  { %v1366_v15 = vunpack.i.h.bf16 %v1364_v11  ;;  %v1365_v17 = vunpack.i.l.bf16 %v1364_v11  ;;  %v418_v43 = vmax.f32 %v389_v57, %v414_v18  ;;  %v420_v44 = vmax.f32 %v391_v55, %v416_v21 }
 0x1e5   :  { %v430_v48 = vsel %vm2279_vm6, %v1370_v13, %v1371_v12  ;;  %v417_v51 = vmax.f32 %v1762_v56, %v403_v39 }
 0x1e6   :  { %v431_v26 = vsel %vm2279_vm6, %v1366_v15, %v1370_v13  ;;  %v433_v27 = vsel %vm2279_vm6, %v1371_v12, %v1365_v17  ;;  %v1379_v28 = vpop.permute.xlu1 %1378  ;;  %v432_v49 = vsel %vm2279_vm6, %v1365_v17, %v1366_v15  ;;  %v448_v56 = vmax.f32 %v419_v47, %v430_v48  ;;  %v1282_v48 = vld [vmem:[%s2261_s2 + $0x4] sm:$0xf] }
 0x1e7   :  { %v1374_v29 = vpop.permute.xlu0 %1373  ;;  %v443_v40 = vsel %vm1794_vm2, %v431_v26, 0.0  ;;  %v445_v41 = vsel %vm1798_vm0, %v433_v27, 0.0  ;;  %v1381_v42 = vunpack.i.h.bf16 %v1379_v28  ;;  %v1380_v45 = vunpack.i.l.bf16 %v1379_v28 }
 0x1e8   :  { %v1376_v46 = vunpack.i.h.bf16 %v1374_v29  ;;  %v1375_v50 = vunpack.i.l.bf16 %v1374_v29  ;;  %v447_v52 = vmax.f32 %v418_v43, %v443_v40  ;;  %v449_v53 = vmax.f32 %v420_v44, %v445_v41 }
 0x1e9   :  { %v459_v59 = vsel %vm2280_vm15, %v1380_v45, %v1381_v42  ;;  %v446_v62 = vmax.f32 %v417_v51, %v432_v49  ;;  %vm1850_vm6 = vcmp.ge.s32.totalorder %v90_v8, 32  ;;  %v273_v44 = vpack.c.bf16 %v1633_v19, %v1633_v19 }
 0x1ea   :  { %v460_v54 = vsel %vm2280_vm15, %v1376_v46, %v1380_v45  ;;  %v1389_v57 = vpop.permute.xlu1 %1388  ;;  %v461_v60 = vsel %vm2280_vm15, %v1375_v50, %v1376_v46  ;;  %v462_v61 = vsel %vm2280_vm15, %v1381_v42, %v1375_v50  ;;  %v478_v7 = vmax.f32 %v449_v53, %v459_v59 }
 0x1eb   :  { %v1384_v55 = vpop.permute.xlu0 %1383  ;;  %v473_v58 = vsel %vm1812_vm7, %v460_v54, 0.0  ;;  %v471_v63 = vsel %vm1808_vm14, %v462_v61, 0.0  ;;  %v1391_v0 = vunpack.i.h.bf16 %v1389_v57  ;;  %v1390_v1 = vunpack.i.l.bf16 %v1389_v57 }
 0x1ec   :  { %v1386_v3 = vunpack.i.h.bf16 %v1384_v55  ;;  %v1385_v4 = vunpack.i.l.bf16 %v1384_v55  ;;  %v477_v33 = vmax.f32 %v448_v56, %v473_v58  ;;  %v475_v9 = vmax.f32 %v446_v62, %v471_v63 }
 0x1ed   :  { %v476_v10 = vmax.f32 %v447_v52, %v461_v60  ;;  %v488_v11 = vsel %vm2281_vm1, %v1390_v1, %v1391_v0  ;;  %vm2282_vm15 = vcmask 1040384   ;;  %v275_v45 = vpack.c.bf16 %v1637_v23, %v1637_v23 }
 0x1ee   :  { %v489_v12 = vsel %vm2281_vm1, %v1386_v3, %v1390_v1  ;;  %v490_v13 = vsel %vm2281_vm1, %v1385_v4, %v1386_v3  ;;  %v491_v8 = vsel %vm2281_vm1, %v1391_v0, %v1385_v4  ;;  %v1862_v15 = vmax.f32 %v478_v7, %v488_v11 }
 0x1ef   :  { %v502_v17 = vsel %vm1850_vm6, %v489_v12, 0.0  ;;  %v500_v18 = vsel %vm1822_vm8, %v491_v8, 0.0  ;;  %v1868_v21 = vmax.f32 %v476_v10, %v490_v13  ;;  %v272_v46 = vpack.c.bf16 %v1631_v16, %v1631_v16 }
 0x1f0   :  { %v1870_v25 = vmax.f32 %v475_v9, %v500_v18  ;;  %v1872_v26 = vmax.f32 %v477_v33, %v502_v17  ;;  %v513_v28 = vpack.c.bf16 %v1862_v15, %v1862_v15  ;;  %v274_v47 = vpack.c.bf16 %v1635_v20, %v1635_v20 }
 0x1f1   :  { %v511_v27 = vpack.c.bf16 %v1868_v21, %v1868_v21  ;;  %vm514_vm1 = vcmask 15360   ;;  %v617_v16 = vsel %vm2282_vm15, %v272_v46, 0 }
 0x1f2   :  { %v1397_v29 = vpack.i.bf16 %v1862_v15, %v1872_v26  ;;  %v1392_v39 = vpack.i.bf16 %v1868_v21, %v1870_v25  ;;  %v510_v40 = vpack.c.bf16 %v1870_v25, %v1870_v25  ;;  %v512_v41 = vpack.c.bf16 %v1872_v26, %v1872_v26  ;;  %1285 = vmatprep.subr.msk.bf16.mxu1 %vm2282_vm15, %v513_v28 }
 0x1f3   :  { %1283 = vmatprep.subr.msk.bf16.mxu0 %vm2282_vm15, %v511_v27  ;;  %v623_v19 = vsel %vm2282_vm15, %v274_v47, 0 }
 0x1f4   :  { %1398 = vrot.lane.b32.xlu1 %v1397_v29, %s1584_s20  ;;  %1393 = vrot.lane.b32.xlu0 %v1392_v39, %s1584_s20  ;;  %v520_v42 = vsel %vm2282_vm15, %v510_v40, 0  ;;  %v526_v43 = vsel %vm2282_vm15, %v512_v41, 0 }
 0x1f5   :  { %532 = vmatpush1.bf16.msra.mxu0 %v520_v42  ;;  %573 = vmatpush1.bf16.msra.mxu1 %v526_v43 }
 0x1f6   :  { %1287 = vmatprep.subr.msk.bf16.mxu0 %vm2282_vm15, %v273_v44  ;;  %1289 = vmatprep.subr.msk.bf16.mxu1 %vm2282_vm15, %v275_v45  ;;  %vm2305_vm15 = vcmp.lt.s32.totalorder %v1663_v34, 15 }
 0x1f8   :  { %1408 = vrot.lane.b32.xlu1 %v1397_v29, %s1583_s1  ;;  %1403 = vrot.lane.b32.xlu0 %v1392_v39, %s1583_s1 }
 0x1f9   :  { %1284 = vmatmul.mubr.msk.bf16.vlgmr.msra.gmra.mrb[4].mxu0 %vm514_vm1, %v1282_v48  ;;  %1286 = vmatmul.mubr.msk.bf16.vlgmr.msra.gmra.mrb[4].mxu1 %vm514_vm1, %v1282_v48 }
 0x1fa   :  { %629 = vmatpush1.bf16.msra.mxu0 %v617_v16  ;;  %670 = vmatpush1.bf16.msra.mxu1 %v623_v19 }
 0x1fb   :  { %701 = vmatprep.mubr.bf16.mxu1 %v1582_v6  ;;  %660 = vmatprep.mubr.bf16.mxu0 %v1582_v6 }
 0x1fc   :  { %1418 = vrot.lane.b32.xlu1 %v1397_v29, %s1585_s21  ;;  %1413 = vrot.lane.b32.xlu0 %v1392_v39, %s1585_s21 }
 0x200   :  { %1428 = vrot.lane.b32.xlu1 %v1397_v29, %s1586_s22  ;;  %1423 = vrot.lane.b32.xlu0 %v1392_v39, %s1586_s22 }
 0x266   :  { %v1399_v20 = vpop.permute.xlu1 %1398  ;;  %v1394_v23 = vpop.permute.xlu0 %1393 }
 0x267   :  { %v1401_v49 = vunpack.i.h.bf16 %v1399_v20  ;;  %v1400_v50 = vunpack.i.l.bf16 %v1399_v20  ;;  %v1396_v51 = vunpack.i.h.bf16 %v1394_v23  ;;  %v1395_v52 = vunpack.i.l.bf16 %v1394_v23 }
 0x269   :  { %v718_v53 = vsel %vm2287_vm5, %v1400_v50, %v1401_v49  ;;  %v719_v54 = vsel %vm2287_vm5, %v1396_v51, %v1400_v50  ;;  %v720_v57 = vsel %vm2287_vm5, %v1395_v52, %v1396_v51  ;;  %v721_v55 = vsel %vm2287_vm5, %v1401_v49, %v1395_v52 }
 0x26a   :  { %v1409_v59 = vpop.permute.xlu1 %1408  ;;  %v1404_v58 = vpop.permute.xlu0 %1403  ;;  %v724_v63 = vsel %vm2286_vm11, %v718_v53, 0.0  ;;  %v723_v0 = vsel %vm2285_vm10, %v719_v54, 0.0  ;;  %v722_v1 = vsel %vm2305_vm15, %v720_v57, 0.0  ;;  %v725_v3 = vsel %vm2283_vm12, %v721_v55, 0.0 }
 0x26b   :  { %v1411_v60 = vunpack.i.h.bf16 %v1409_v59  ;;  %v1410_v61 = vunpack.i.l.bf16 %v1409_v59  ;;  %v1406_v56 = vunpack.i.h.bf16 %v1404_v58  ;;  %v1405_v62 = vunpack.i.l.bf16 %v1404_v58 }
 0x26c   :  { %v728_v12 = vmax.f32 %v1872_v26, %v724_v63  ;;  %v727_v13 = vmax.f32 %v1868_v21, %v723_v0  ;;  %v726_v8 = vmax.f32 %v1870_v25, %v722_v1  ;;  %v729_v17 = vmax.f32 %v1862_v15, %v725_v3 }
 0x26d   :  { %v738_v33 = vsel %vm2284_vm3, %v1410_v61, %v1411_v60  ;;  %v739_v9 = vsel %vm2284_vm3, %v1406_v56, %v1410_v61  ;;  %v740_v10 = vsel %vm2284_vm3, %v1405_v62, %v1406_v56  ;;  %v741_v11 = vsel %vm2284_vm3, %v1411_v60, %v1405_v62 }
 0x26e   :  { %v1419_v4 = vpop.permute.xlu1 %1418  ;;  %v1414_v7 = vpop.permute.xlu0 %1413  ;;  %vm2306_vm15 = vcmp.lt.s32.totalorder %v1669_v36, 14  ;;  %vm2307_vm12 = vcmp.lt.s32.totalorder %v1666_v35, 14  ;;  %vm2308_vm3 = vcmp.lt.s32.totalorder %v1663_v34, 14  ;;  %vm2309_vm10 = vcmp.lt.s32.totalorder %v1672_v37, 14 }
 0x26f   :  { %v1421_v18 = vunpack.i.h.bf16 %v1419_v4  ;;  %v1420_v27 = vunpack.i.l.bf16 %v1419_v4  ;;  %v1416_v28 = vunpack.i.h.bf16 %v1414_v7  ;;  %v1415_v29 = vunpack.i.l.bf16 %v1414_v7 }
 0x270   :  { %v744_v39 = vsel %vm2306_vm15, %v738_v33, 0.0  ;;  %v743_v40 = vsel %vm2307_vm12, %v739_v9, 0.0  ;;  %v742_v41 = vsel %vm2308_vm3, %v740_v10, 0.0  ;;  %v745_v21 = vsel %vm2309_vm10, %v741_v11, 0.0  ;;  %v271_v10 = vld [vmem:[%s2261_s2] sm:$0xf] }
 0x271   :  { %vm2310_vm11 = vcmp.lt.s32.totalorder %v1651_v30, 1  ;;  %vm2314_vm12 = vcmp.ge.s32.totalorder %v1672_v37, 1  ;;  %vm2315_vm3 = vcmp.ge.s32.totalorder %v1669_v36, 1  ;;  %vm2316_vm10 = vcmp.ge.s32.totalorder %v1663_v34, 1  ;;  %1288 = vmatmul.mubr.msk.bf16.vlgmr.msra.gmra.mrb[8].mxu0 %vm514_vm1, %v271_v10  ;;  %1290 = vmatmul.mubr.msk.bf16.vlgmr.msra.gmra.mrb[8].mxu1 %vm514_vm1, %v271_v10 }
 0x272   :  { %v758_v25 = vsel %vm2310_vm11, %v1420_v27, %v1421_v18  ;;  %vm2311_vm5 = vmmov %vm2310_vm11  ;;  %v1429_v43 = vpop.permute.xlu1 %1428  ;;  %v1424_v44 = vpop.permute.xlu0 %1423  ;;  %vm2317_vm11 = vcmp.ge.s32.totalorder %v1666_v35, 1  ;;  %v748_v16 = vmax.f32 %v728_v12, %v744_v39  ;;  %v746_v19 = vmax.f32 %v726_v8, %v742_v41  ;;  %923 = vmatprep.mubr.bf16.mxu0 %v1582_v6  ;;  %964 = vmatprep.mubr.bf16.mxu1 %v1582_v6 }
 0x273   :  { %v759_v15 = vsel %vm2311_vm5, %v1416_v28, %v1420_v27  ;;  %vm2312_vm9 = vmmov %vm2311_vm5  ;;  %v765_v45 = vsel %vm2314_vm12, %v758_v25, 0.0  ;;  %v747_v20 = vmax.f32 %v727_v13, %v743_v40  ;;  %v749_v23 = vmax.f32 %v729_v17, %v745_v21 }
 0x274   :  { %v760_v26 = vsel %vm2312_vm9, %v1415_v29, %v1416_v28  ;;  %vm2313_vm15 = vmmov %vm2311_vm5  ;;  %v764_v46 = vsel %vm2315_vm3, %v759_v15, 0.0  ;;  %v1431_v49 = vunpack.i.h.bf16 %v1429_v43  ;;  %v1430_v50 = vunpack.i.l.bf16 %v1429_v43 }
 0x275   :  { %v761_v42 = vsel %vm2313_vm15, %v1421_v18, %v1415_v29  ;;  %v763_v48 = vsel %vm2317_vm11, %v760_v26, 0.0  ;;  %v1426_v51 = vunpack.i.h.bf16 %v1424_v44  ;;  %v1425_v52 = vunpack.i.l.bf16 %v1424_v44 }
 0x276   :  { %v762_v47 = vsel %vm2316_vm10, %v761_v42, 0.0  ;;  %v769_v53 = vmax.f32 %v749_v23, %v765_v45  ;;  %v768_v54 = vmax.f32 %v748_v16, %v764_v46  ;;  %v767_v55 = vmax.f32 %v747_v20, %v763_v48 }
 0x277   :  { %v766_v57 = vmax.f32 %v746_v19, %v762_v47  ;;  %vm2318_vm5 = vcmp.lt.s32.totalorder %v1651_v30, 2  ;;  %vm2322_vm3 = vcmp.ge.s32.totalorder %v1672_v37, 2  ;;  %vm2323_vm10 = vcmp.ge.s32.totalorder %v1669_v36, 2 }
 0x278   :  { %v778_v59 = vsel %vm2318_vm5, %v1430_v50, %v1431_v49  ;;  %vm2319_vm9 = vmmov %vm2318_vm5  ;;  %vm2324_vm11 = vcmp.ge.s32.totalorder %v1663_v34, 2 }
 0x279   :  { %v779_v58 = vsel %vm2319_vm9, %v1426_v51, %v1430_v50  ;;  %vm2320_vm15 = vmmov %vm2318_vm5  ;;  %v785_v56 = vsel %vm2322_vm3, %v778_v59, 0.0  ;;  %vm2326_vm9 = vcmp.lt.s32.totalorder %v1651_v30, 112  ;;  %vm2329_vm3 = vcmp.lt.s32.totalorder %v1651_v30, 96 }
 0x27a   :  { %v780_v60 = vsel %vm2320_vm15, %v1425_v52, %v1426_v51  ;;  %vm2321_vm12 = vmmov %vm2318_vm5  ;;  %v784_v62 = vsel %vm2323_vm10, %v779_v58, 0.0  ;;  %vm2325_vm5 = vcmp.ge.s32.totalorder %v1666_v35, 2  ;;  %v789_v1 = vmax.f32 %v769_v53, %v785_v56 }
 0x27b   :  { %v781_v61 = vsel %vm2321_vm12, %v1431_v49, %v1425_v52  ;;  %v783_v0 = vsel %vm2325_vm5, %v780_v60, 0.0  ;;  %v788_v7 = vmax.f32 %v768_v54, %v784_v62  ;;  %vm2327_vm15 = vmmov %vm2326_vm9 }
 0x27c   :  { %v782_v63 = vsel %vm2324_vm11, %v781_v61, 0.0  ;;  %v787_v4 = vmax.f32 %v767_v55, %v783_v0  ;;  %vm2328_vm12 = vmmov %vm2326_vm9 }
 0x27d   :  { %v1985_v3 = vmax.f32 %v766_v57, %v782_v63  ;;  %v1437_v33 = vpack.i.bf16 %v789_v1, %v788_v7  ;;  %vm2330_vm10 = vmmov %vm2329_vm3 }
 0x27e   :  { %vm2331_vm11 = vmmov %vm2326_vm9 }
 0x27f   :  { %v1432_v9 = vpack.i.bf16 %v787_v4, %v1985_v3  ;;  %1438 = vrot.lane.b32.xlu1 %v1437_v33, %s1587_s23  ;;  %vm2332_vm5 = vmmov %vm2329_vm3 }
 0x281   :  { %1433 = vrot.lane.b32.xlu0 %v1432_v9, %s1587_s23 }
 0x283   :  { %1448 = vrot.lane.b32.xlu1 %v1437_v33, %s1588_s24 }
 0x285   :  { %1443 = vrot.lane.b32.xlu0 %v1432_v9, %s1588_s24 }
 0x287   :  { %1458 = vrot.lane.b32.xlu1 %v1437_v33, %s1589_s25 }
 0x289   :  { %1453 = vrot.lane.b32.xlu0 %v1432_v9, %s1589_s25 }
 0x28b   :  { %1468 = vrot.lane.b32.xlu1 %v1437_v33, %s1590_s26 }
 0x28d   :  { %1463 = vrot.lane.b32.xlu0 %v1432_v9, %s1590_s26 }
 0x2f1   :  { %v1439_v11 = vpop.permute.xlu1 %1438 }
 0x2f2   :  { %v1441_v13 = vunpack.i.h.bf16 %v1439_v11  ;;  %v1440_v8 = vunpack.i.l.bf16 %v1439_v11 }
 0x2f3   :  { %v1434_v12 = vpop.permute.xlu0 %1433 }
 0x2f4   :  { %v1436_v17 = vunpack.i.h.bf16 %v1434_v12  ;;  %v1435_v18 = vunpack.i.l.bf16 %v1434_v12  ;;  %v798_v42 = vsel %vm2328_vm12, %v1440_v8, %v1441_v13 }
 0x2f5   :  { %v1449_v29 = vpop.permute.xlu1 %1448  ;;  %v808_v51 = vmax.f32 %v788_v7, %v798_v42 }
 0x2f6   :  { %v799_v27 = vsel %vm2326_vm9, %v1436_v17, %v1440_v8  ;;  %v801_v28 = vsel %vm2327_vm15, %v1441_v13, %v1435_v18  ;;  %v1451_v40 = vunpack.i.h.bf16 %v1449_v29  ;;  %v1450_v41 = vunpack.i.l.bf16 %v1449_v29  ;;  %vm2333_vm9 = vmmov %vm2329_vm3 }
 0x2f7   :  { %v1444_v39 = vpop.permute.xlu0 %1443  ;;  %v803_v15 = vsel %vm1779_vm4, %v799_v27, 0.0  ;;  %v805_v26 = vsel %vm1785_vm13, %v801_v28, 0.0  ;;  %v800_v47 = vsel %vm2331_vm11, %v1435_v18, %v1436_v17  ;;  %vm2334_vm15 = vcmp.lt.s32.totalorder %v1651_v30, 16 }
 0x2f8   :  { %v1446_v21 = vunpack.i.h.bf16 %v1444_v39  ;;  %v1445_v25 = vunpack.i.l.bf16 %v1444_v39  ;;  %v807_v20 = vmax.f32 %v787_v4, %v803_v15  ;;  %v809_v23 = vmax.f32 %v789_v1, %v805_v26  ;;  %vm2335_vm12 = vmmov %vm2334_vm15 }
 0x2f9   :  { %v1459_v45 = vpop.permute.xlu1 %1458  ;;  %v818_v52 = vsel %vm2332_vm5, %v1450_v41, %v1451_v40  ;;  %v806_v57 = vmax.f32 %v1985_v3, %v800_v47  ;;  %vm2338_vm11 = vcmp.lt.s32.totalorder %v1651_v30, 32 }
 0x2fa   :  { %v819_v43 = vsel %vm2329_vm3, %v1446_v21, %v1450_v41  ;;  %v821_v44 = vsel %vm2330_vm10, %v1451_v40, %v1445_v25  ;;  %v1461_v19 = vunpack.i.h.bf16 %v1459_v45  ;;  %v1460_v49 = vunpack.i.l.bf16 %v1459_v45  ;;  %vm2336_vm3 = vmmov %vm2335_vm12 }
 0x2fb   :  { %v1454_v46 = vpop.permute.xlu0 %1453  ;;  %v823_v48 = vsel %vm1794_vm2, %v819_v43, 0.0  ;;  %v825_v16 = vsel %vm1798_vm0, %v821_v44, 0.0  ;;  %v820_v53 = vsel %vm2333_vm9, %v1445_v25, %v1446_v21  ;;  %vm2337_vm10 = vmmov %vm2336_vm3  ;;  %v828_v1 = vmax.f32 %v808_v51, %v818_v52 }
 0x2fc   :  { %v1456_v50 = vunpack.i.h.bf16 %v1454_v46  ;;  %v1455_v54 = vunpack.i.l.bf16 %v1454_v46  ;;  %v827_v55 = vmax.f32 %v807_v20, %v823_v48  ;;  %v829_v59 = vmax.f32 %v809_v23, %v825_v16  ;;  %vm2339_vm5 = vmmov %vm2338_vm11 }
 0x2fd   :  { %v1469_v60 = vpop.permute.xlu1 %1468  ;;  %v838_v56 = vsel %vm2335_vm12, %v1460_v49, %v1461_v19  ;;  %v826_v3 = vmax.f32 %v806_v57, %v820_v53  ;;  %vm2340_vm9 = vmmov %vm2339_vm5  ;;  %vm2342_vm12 = vcmask 1040384  }
 0x2fe   :  { %v839_v58 = vsel %vm2334_vm15, %v1456_v50, %v1460_v49  ;;  %v840_v63 = vsel %vm2336_vm3, %v1455_v54, %v1456_v50  ;;  %v841_v0 = vsel %vm2337_vm10, %v1461_v19, %v1455_v54  ;;  %v1471_v7 = vunpack.i.h.bf16 %v1469_v60  ;;  %vm2341_vm15 = vmmov %vm2339_vm5 }
 0x2ff   :  { %v1464_v61 = vpop.permute.xlu0 %1463  ;;  %v844_v62 = vsel %vm1812_vm7, %v839_v58, 0.0  ;;  %v842_v4 = vsel %vm1808_vm14, %v841_v0, 0.0  ;;  %v1470_v33 = vunpack.i.l.bf16 %v1469_v60  ;;  %v849_v11 = vmax.f32 %v829_v59, %v838_v56  ;;  %vm2343_vm3 = vmmov %vm2342_vm12 }
 0x300   :  { %v1466_v9 = vunpack.i.h.bf16 %v1464_v61  ;;  %v1465_v10 = vunpack.i.l.bf16 %v1464_v61  ;;  %v848_v12 = vmax.f32 %v828_v1, %v844_v62  ;;  %v846_v13 = vmax.f32 %v826_v3, %v842_v4  ;;  %vm2344_vm10 = vmmov %vm2343_vm3 }
 0x301   :  { %v847_v8 = vmax.f32 %v827_v55, %v840_v63  ;;  %v858_v17 = vsel %vm2338_vm11, %v1470_v33, %v1471_v7  ;;  %vm2345_vm11 = vmmov %vm2343_vm3 }
 0x302   :  { %v859_v18 = vsel %vm2339_vm5, %v1466_v9, %v1470_v33  ;;  %v860_v27 = vsel %vm2340_vm9, %v1465_v10, %v1466_v9  ;;  %v861_v28 = vsel %vm2341_vm15, %v1471_v7, %v1465_v10  ;;  %v2048_v29 = vmax.f32 %v849_v11, %v858_v17 }
 0x303   :  { %v864_v39 = vsel %vm1850_vm6, %v859_v18, 0.0  ;;  %v862_v40 = vsel %vm1822_vm8, %v861_v28, 0.0  ;;  %v2054_v41 = vmax.f32 %v847_v8, %v860_v27  ;;  %vm2346_vm5 = vcmp.lt.s32.totalorder %v1651_v30, 127 }
 0x304   :  { %v2056_v21 = vmax.f32 %v846_v13, %v862_v40  ;;  %v2058_v25 = vmax.f32 %v848_v12, %v864_v39  ;;  %v875_v26 = vpack.c.bf16 %v2048_v29, %v2048_v29  ;;  %vm2347_vm9 = vmmov %vm2346_vm5 }
 0x305   :  { %v873_v15 = vpack.c.bf16 %v2054_v41, %v2054_v41  ;;  %vm2348_vm15 = vmmov %vm2346_vm5 }
 0x306   :  { %v1477_v42 = vpack.i.bf16 %v2048_v29, %v2058_v25  ;;  %v1472_v43 = vpack.i.bf16 %v2054_v41, %v2056_v21  ;;  %v872_v44 = vpack.c.bf16 %v2056_v21, %v2056_v21  ;;  %v874_v45 = vpack.c.bf16 %v2058_v25, %v2058_v25  ;;  %1294 = vmatprep.subr.msk.bf16.mxu1 %vm2343_vm3, %v875_v26 }
 0x307   :  { %1292 = vmatprep.subr.msk.bf16.mxu0 %vm2342_vm12, %v873_v15  ;;  %vm2349_vm12 = vmmov %vm2346_vm5  ;;  %vm2350_vm3 = vcmp.lt.s32.totalorder %v1669_v36, 15 }
 0x308   :  { %1478 = vrot.lane.b32.xlu1 %v1477_v42, %s1584_s20  ;;  %1473 = vrot.lane.b32.xlu0 %v1472_v43, %s1584_s20  ;;  %v880_v46 = vsel %vm2344_vm10, %v872_v44, 0  ;;  %v886_v47 = vsel %vm2345_vm11, %v874_v45, 0  ;;  %vm2351_vm10 = vcmp.lt.s32.totalorder %v1666_v35, 15  ;;  %vm2352_vm11 = vcmp.lt.s32.totalorder %v1663_v34, 15 }
 0x309   :  { %892 = vmatpush1.bf16.msra.mxu0 %v880_v46  ;;  %933 = vmatpush1.bf16.msra.mxu1 %v886_v47 }
 0x30c   :  { %1488 = vrot.lane.b32.xlu1 %v1477_v42, %s1583_s1  ;;  %1483 = vrot.lane.b32.xlu0 %v1472_v43, %s1583_s1 }
 0x310   :  { %1498 = vrot.lane.b32.xlu1 %v1477_v42, %s1585_s21  ;;  %1493 = vrot.lane.b32.xlu0 %v1472_v43, %s1585_s21 }
 0x314   :  { %1508 = vrot.lane.b32.xlu1 %v1477_v42, %s1586_s22  ;;  %1503 = vrot.lane.b32.xlu0 %v1472_v43, %s1586_s22 }
 0x37a   :  { %v1479_v48 = vpop.permute.xlu1 %1478  ;;  %v1474_v16 = vpop.permute.xlu0 %1473 }
 0x37b   :  { %v1481_v19 = vunpack.i.h.bf16 %v1479_v48  ;;  %v1480_v20 = vunpack.i.l.bf16 %v1479_v48  ;;  %v1476_v23 = vunpack.i.h.bf16 %v1474_v16  ;;  %v1475_v49 = vunpack.i.l.bf16 %v1474_v16 }
 0x37d   :  { %v985_v50 = vsel %vm2346_vm5, %v1480_v20, %v1481_v19  ;;  %v986_v51 = vsel %vm2347_vm9, %v1476_v23, %v1480_v20  ;;  %v987_v52 = vsel %vm2348_vm15, %v1475_v49, %v1476_v23  ;;  %v988_v53 = vsel %vm2349_vm12, %v1481_v19, %v1475_v49 }
 0x37e   :  { %v1489_v54 = vpop.permute.xlu1 %1488  ;;  %v1484_v57 = vpop.permute.xlu0 %1483  ;;  %v991_v61 = vsel %vm2350_vm3, %v985_v50, 0.0  ;;  %v990_v56 = vsel %vm2351_vm10, %v986_v51, 0.0  ;;  %v989_v62 = vsel %vm2352_vm11, %v987_v52, 0.0  ;;  %vm2353_vm5 = vcmp.lt.s32.totalorder %v1672_v37, 15 }
 0x37f   :  { %v1491_v55 = vunpack.i.h.bf16 %v1489_v54  ;;  %v1490_v59 = vunpack.i.l.bf16 %v1489_v54  ;;  %v1486_v58 = vunpack.i.h.bf16 %v1484_v57  ;;  %v1485_v60 = vunpack.i.l.bf16 %v1484_v57 }
 0x380   :  { %v992_v63 = vsel %vm2353_vm5, %v988_v53, 0.0  ;;  %vm2354_vm9 = vcmp.lt.s32.totalorder %v1651_v30, 126  ;;  %v995_v9 = vmax.f32 %v2058_v25, %v991_v61  ;;  %v994_v10 = vmax.f32 %v2054_v41, %v990_v56 }
 0x381   :  { %v1005_v3 = vsel %vm2354_vm9, %v1490_v59, %v1491_v55  ;;  %vm2355_vm15 = vmmov %vm2354_vm9  ;;  %v993_v11 = vmax.f32 %v2056_v21, %v989_v62  ;;  %v996_v12 = vmax.f32 %v2048_v29, %v992_v63  ;;  %vm2358_vm10 = vcmp.lt.s32.totalorder %v1669_v36, 14  ;;  %v1291_v29 = vld [vmem:[%s2261_s2 + $0x8] sm:$0xf]  ;;  %s1591_s2 = smov [#allocation2]  }
 0x382   :  { %v1499_v0 = vpop.permute.xlu1 %1498  ;;  %v1494_v1 = vpop.permute.xlu0 %1493  ;;  %v1006_v4 = vsel %vm2355_vm15, %v1486_v58, %v1490_v59  ;;  %vm2356_vm12 = vmmov %vm2354_vm9  ;;  %v1011_v27 = vsel %vm2358_vm10, %v1005_v3, 0.0  ;;  %vm2359_vm11 = vcmp.lt.s32.totalorder %v1666_v35, 14  ;;  %vm2360_vm5 = vcmp.lt.s32.totalorder %v1663_v34, 14  ;;  %1293 = vmatmul.mubr.msk.bf16.vlgmr.msra.gmra.mrb[12].mxu0 %vm514_vm1, %v1291_v29  ;;  %1295 = vmatmul.mubr.msk.bf16.vlgmr.msra.gmra.mrb[12].mxu1 %vm514_vm1, %v1291_v29  ;;  %s1268_s10 = sshll.u32 %s1591_s2, 4  ;;  %s1269_s10 = int_to_ptr.vmem [resolvable:$true] %s1268_s10 }
 0x383   :  { %v1007_v7 = vsel %vm2356_vm12, %v1485_v60, %v1486_v58  ;;  %vm2357_vm3 = vmmov %vm2354_vm9  ;;  %v1501_v13 = vunpack.i.h.bf16 %v1499_v0  ;;  %v1500_v8 = vunpack.i.l.bf16 %v1499_v0  ;;  %v1496_v17 = vunpack.i.h.bf16 %v1494_v1  ;;  %1190 = vmatprep.mubr.bf16.mxu0 %v1582_v6  ;;  %1231 = vmatprep.mubr.bf16.mxu1 %v1582_v6  ;;  %s1557_s11 = scalar_lea.vmem %s1269_s10, 512  ;;  %p1562_p1 = scmp.lt.s32.totalorder %s1269_s10, %s1269_s10 }
 0x384   :  { %v1008_v33 = vsel %vm2357_vm3, %v1491_v55, %v1485_v60  ;;  %v1495_v18 = vunpack.i.l.bf16 %v1494_v1  ;;  %v1010_v28 = vsel %vm2359_vm11, %v1006_v4, 0.0  ;;  %v1009_v39 = vsel %vm2360_vm5, %v1007_v7, 0.0  ;;  %p1558_p0 = scmp.ne.s32.totalorder %s1269_s10, %s1557_s11  ;;  %p1563_p2 = scmp.lt.s32.totalorder %s1557_s11, %s1557_s11 }
 0x385   :  { %vm2361_vm9 = vcmp.lt.s32.totalorder %v1672_v37, 14  ;;  %vm2362_vm15 = vcmp.lt.s32.totalorder %v1651_v30, 1  ;;  %vm2366_vm11 = vcmp.ge.s32.totalorder %v1672_v37, 1  ;;  %vm2367_vm5 = vcmp.ge.s32.totalorder %v1669_v36, 1 }
 0x386   :  { %v1012_v40 = vsel %vm2361_vm9, %v1008_v33, 0.0  ;;  %v1025_v41 = vsel %vm2362_vm15, %v1500_v8, %v1501_v13  ;;  %vm2363_vm12 = vmmov %vm2362_vm15  ;;  %v1509_v26 = vpop.permute.xlu1 %1508  ;;  %v1504_v42 = vpop.permute.xlu0 %1503  ;;  %vm2368_vm9 = vcmp.ge.s32.totalorder %v1663_v34, 1  ;;  %vm2369_vm15 = vcmp.ge.s32.totalorder %v1666_v35, 1  ;;  %p1564_p3 = por %p1563_p2, %p1562_p1 }
 0x387   :  { %v1026_v21 = vsel %vm2363_vm12, %v1496_v17, %v1500_v8  ;;  %vm2364_vm3 = vmmov %vm2363_vm12  ;;  %v1032_v43 = vsel %vm2366_vm11, %v1025_v41, 0.0  ;;  %v1015_v47 = vmax.f32 %v995_v9, %v1011_v27  ;;  %v1013_v48 = vmax.f32 %v993_v11, %v1009_v39 }
 0x388   :  { %v1027_v25 = vsel %vm2364_vm3, %v1495_v18, %v1496_v17  ;;  %vm2365_vm10 = vmmov %vm2364_vm3  ;;  %v1031_v44 = vsel %vm2367_vm5, %v1026_v21, 0.0  ;;  %v1014_v16 = vmax.f32 %v994_v10, %v1010_v28  ;;  %v1016_v19 = vmax.f32 %v996_v12, %v1012_v40  ;;  %p1565_p4 = pnand %p1564_p3, %p1558_p0 }
 0x389   :  { %v1028_v15 = vsel %vm2365_vm10, %v1501_v13, %v1495_v18  ;;  %v1030_v46 = vsel %vm2369_vm15, %v1027_v25, 0.0  ;;  %v1511_v20 = vunpack.i.h.bf16 %v1509_v26  ;;  %v1510_v23 = vunpack.i.l.bf16 %v1509_v26 }
 0x38a   :  { %v1029_v45 = vsel %vm2368_vm9, %v1028_v15, 0.0  ;;  %v1506_v49 = vunpack.i.h.bf16 %v1504_v42  ;;  %v1505_v50 = vunpack.i.l.bf16 %v1504_v42  ;;  %v1036_v51 = vmax.f32 %v1016_v19, %v1032_v43 }
 0x38b   :  { %v1035_v52 = vmax.f32 %v1015_v47, %v1031_v44  ;;  %v1033_v53 = vmax.f32 %v1013_v48, %v1029_v45  ;;  %v1034_v54 = vmax.f32 %v1014_v16, %v1030_v46  ;;  %vm2370_vm12 = vcmp.lt.s32.totalorder %v1651_v30, 2 }
 0x38c   :  { %v1045_v57 = vsel %vm2370_vm12, %v1510_v23, %v1511_v20  ;;  %vm2371_vm3 = vmmov %vm2370_vm12  ;;  %vm2374_vm5 = vcmp.ge.s32.totalorder %v1672_v37, 2  ;;  %vm2375_vm9 = vcmp.ge.s32.totalorder %v1669_v36, 2  ;;  %vm2376_vm15 = vcmp.ge.s32.totalorder %v1663_v34, 2  ;;  %v1244_v34 = vld [vmem:[%s2262_s3] sm:$0xff]  ;;  %v606_v36 = vpop.f32.mrb[4].mxu1 }
 0x38d   :  { %v1046_v55 = vsel %vm2371_vm3, %v1506_v49, %v1510_v23  ;;  %vm2372_vm10 = vmmov %vm2371_vm3  ;;  %v1052_v58 = vsel %vm2374_vm5, %v1045_v57, 0.0  ;;  %vm2377_vm12 = vcmp.ge.s32.totalorder %v1666_v35, 2  ;;  %v565_v35 = vpop.f32.mrb[4].mxu0  ;;  %v608_v7 = vpop.f32.mrb[5].mxu1 }
 0x38e   :  { %v1047_v59 = vsel %vm2372_vm10, %v1505_v50, %v1506_v49  ;;  %vm2373_vm11 = vmmov %vm2371_vm3  ;;  %v1051_v60 = vsel %vm2375_vm9, %v1046_v55, 0.0  ;;  %v1056_v62 = vmax.f32 %v1036_v51, %v1052_v58  ;;  %v567_v4 = vpop.f32.mrb[5].mxu0  ;;  %v610_v9 = vpop.f32.mrb[6].mxu1  ;;  %vm2378_vm3 = vcmp.lt.s32.totalorder %v1651_v30, 112 }
 0x38f   :  { %v1048_v6 = vsel %vm2373_vm11, %v1511_v20, %v1505_v50  ;;  %v1050_v56 = vsel %vm2377_vm12, %v1047_v59, 0.0  ;;  %v2161_v1 = vmax.f32 %v1035_v52, %v1051_v60  ;;  %v569_v33 = vpop.f32.mrb[6].mxu0  ;;  %v611_v11 = vpop.f32.mrb[7].mxu1  ;;  %vm2379_vm10 = vmmov %vm2378_vm3  ;;  %vm2382_vm9 = vcmp.lt.s32.totalorder %v1651_v30, 96 }
 0x390   :  { %v1049_v61 = vsel %vm2376_vm15, %v1048_v6, 0.0  ;;  %v1054_v0 = vmax.f32 %v1034_v54, %v1050_v56  ;;  %v570_v10 = vpop.f32.mrb[7].mxu0  ;;  %v703_v13 = vpop.f32.mrb[8].mxu1  ;;  %vm2380_vm11 = vmmov %vm2378_vm3 }
 0x391   :  { %v2159_v63 = vmax.f32 %v1033_v53, %v1049_v61  ;;  %v1517_v3 = vpack.i.bf16 %v1056_v62, %v2161_v1  ;;  %v662_v12 = vpop.f32.mrb[8].mxu0  ;;  %v2178_v17 = vadd.f32 %v703_v13, %v606_v36  ;;  %v705_v27 = vpop.f32.mrb[9].mxu1  ;;  %vm2381_vm5 = vmmov %vm2378_vm3 }
 0x392   :  { %v2176_v8 = vadd.f32 %v662_v12, %v565_v35  ;;  %v664_v18 = vpop.f32.mrb[9].mxu0  ;;  %v2182_v39 = vadd.f32 %v705_v27, %v608_v7  ;;  %v707_v29 = vpop.f32.mrb[10].mxu1  ;;  %vm2383_vm15 = vmmov %vm2382_vm9 }
 0x393   :  { %v1512_v37 = vpack.i.bf16 %v1054_v0, %v2159_v63  ;;  %1518 = vrot.lane.b32.xlu1 %v1517_v3, %s1587_s23  ;;  %v2180_v28 = vadd.f32 %v664_v18, %v567_v4  ;;  %v666_v40 = vpop.f32.mrb[10].mxu0  ;;  %v708_v21 = vpop.f32.mrb[11].mxu1 }
 0x394   :  { %v667_v41 = vpop.f32.mrb[11].mxu0 }
 0x395   :  { %1513 = vrot.lane.b32.xlu0 %v1512_v37, %s1587_s23 }
 0x397   :  { %1528 = vrot.lane.b32.xlu1 %v1517_v3, %s1588_s24 }
 0x399   :  { %1523 = vrot.lane.b32.xlu0 %v1512_v37, %s1588_s24 }
 0x39b   :  { %1538 = vrot.lane.b32.xlu1 %v1517_v3, %s1589_s25 }
 0x39d   :  { %1533 = vrot.lane.b32.xlu0 %v1512_v37, %s1589_s25 }
 0x39f   :  { %1548 = vrot.lane.b32.xlu1 %v1517_v3, %s1590_s26 }
 0x3a1   :  { %1543 = vrot.lane.b32.xlu0 %v1512_v37, %s1590_s26 }
 0x3a5   :  { %1247 = vperm.xlu0 %1552, %v1244_v34  }
 0x405   :  { %v1519_v25 = vpop.permute.xlu1 %1518 }
 0x406   :  { %v1521_v26 = vunpack.i.h.bf16 %v1519_v25  ;;  %v1520_v42 = vunpack.i.l.bf16 %v1519_v25 }
 0x407   :  { %v1514_v15 = vpop.permute.xlu0 %1513 }
 0x408   :  { %v1516_v43 = vunpack.i.h.bf16 %v1514_v15  ;;  %v1515_v44 = vunpack.i.l.bf16 %v1514_v15  ;;  %v1065_v51 = vsel %vm2380_vm11, %v1520_v42, %v1521_v26 }
 0x409   :  { %v1529_v47 = vpop.permute.xlu1 %1528  ;;  %v1075_v3 = vmax.f32 %v2161_v1, %v1065_v51 }
 0x40a   :  { %v1068_v45 = vsel %vm2378_vm3, %v1521_v26, %v1515_v44  ;;  %v1066_v46 = vsel %vm2379_vm10, %v1516_v43, %v1520_v42  ;;  %v1531_v16 = vunpack.i.h.bf16 %v1529_v47  ;;  %v1530_v19 = vunpack.i.l.bf16 %v1529_v47 }
 0x40b   :  { %v1524_v48 = vpop.permute.xlu0 %1523  ;;  %v1072_v20 = vsel %vm1785_vm13, %v1068_v45, 0.0  ;;  %v1070_v50 = vsel %vm1779_vm4, %v1066_v46, 0.0  ;;  %v1067_v52 = vsel %vm2381_vm5, %v1515_v44, %v1516_v43  ;;  %vm2384_vm4 = vmmov %vm2382_vm9  ;;  %vm2390_vm10 = vcmp.lt.s32.totalorder %v1651_v30, 32 }
 0x40c   :  { %v1526_v23 = vunpack.i.h.bf16 %v1524_v48  ;;  %v1525_v49 = vunpack.i.l.bf16 %v1524_v48  ;;  %v1076_v55 = vmax.f32 %v1056_v62, %v1072_v20  ;;  %v1074_v58 = vmax.f32 %v1054_v0, %v1070_v50  ;;  %vm2385_vm13 = vmmov %vm2384_vm4 }
 0x40d   :  { %v1539_v57 = vpop.permute.xlu1 %1538  ;;  %v1085_v60 = vsel %vm2384_vm4, %v1530_v19, %v1531_v16  ;;  %v1073_v14 = vmax.f32 %v2159_v63, %v1067_v52  ;;  %vm2394_vm5 = vcmask 1040384  }
 0x40e   :  { %v1086_v53 = vsel %vm2382_vm9, %v1526_v23, %v1530_v19  ;;  %v1088_v54 = vsel %vm2383_vm15, %v1531_v16, %v1525_v49  ;;  %v1541_v6 = vunpack.i.h.bf16 %v1539_v57  ;;  %v1540_v61 = vunpack.i.l.bf16 %v1539_v57  ;;  %vm2395_vm9 = vmmov %vm2394_vm5 }
 0x40f   :  { %v1534_v31 = vpop.permute.xlu0 %1533  ;;  %v1090_v59 = vsel %vm1794_vm2, %v1086_v53, 0.0  ;;  %v1092_v5 = vsel %vm1798_vm0, %v1088_v54, 0.0  ;;  %v1087_v37 = vsel %vm2385_vm13, %v1525_v49, %v1526_v23  ;;  %vm2386_vm2 = vcmp.lt.s32.totalorder %v1651_v30, 16  ;;  %vm2396_vm15 = vmmov %vm2394_vm5 }
 0x410   :  { %v1536_v56 = vunpack.i.h.bf16 %v1534_v31  ;;  %v1096_v34 = vmax.f32 %v1076_v55, %v1092_v5  ;;  %v1535_v62 = vunpack.i.l.bf16 %v1534_v31  ;;  %v1094_v35 = vmax.f32 %v1074_v58, %v1090_v59  ;;  %vm2387_vm0 = vmmov %vm2386_vm2 }
 0x411   :  { %v1105_v32 = vsel %vm2386_vm2, %v1540_v61, %v1541_v6  ;;  %v1549_v36 = vpop.permute.xlu1 %1548  ;;  %v1095_v7 = vmax.f32 %v1075_v3, %v1085_v60  ;;  %vm2388_vm12 = vmmov %vm2387_vm0  ;;  %v1093_v63 = vmax.f32 %v1073_v14, %v1087_v37 }
 0x412   :  { %v1106_v0 = vsel %vm2387_vm0, %v1536_v56, %v1540_v61  ;;  %v1107_v33 = vsel %vm2388_vm12, %v1535_v62, %v1536_v56  ;;  %vm2389_vm3 = vmmov %vm2387_vm0  ;;  %v1551_v11 = vunpack.i.h.bf16 %v1549_v36  ;;  %v1550_v12 = vunpack.i.l.bf16 %v1549_v36 }
 0x413   :  { %v1544_v4 = vpop.permute.xlu0 %1543  ;;  %v1111_v1 = vsel %vm1812_vm7, %v1106_v0, 0.0  ;;  %v1108_v9 = vsel %vm2389_vm3, %v1541_v6, %v1535_v62  ;;  %v1116_v13 = vmax.f32 %v1096_v34, %v1105_v32  ;;  %v1114_v40 = vmax.f32 %v1094_v35, %v1107_v33  ;;  %vm2391_vm7 = vmmov %vm2390_vm10 }
 0x414   :  { %v1109_v10 = vsel %vm1808_vm14, %v1108_v9, 0.0  ;;  %v1546_v18 = vunpack.i.h.bf16 %v1544_v4  ;;  %v1545_v27 = vunpack.i.l.bf16 %v1544_v4  ;;  %v1125_v24 = vsel %vm2390_vm10, %v1550_v12, %v1551_v11  ;;  %vm2392_vm11 = vmmov %vm2391_vm7 }
 0x415   :  { %v1113_v29 = vmax.f32 %v1093_v63, %v1109_v10  ;;  %v1115_v41 = vmax.f32 %v1095_v7, %v1111_v1  ;;  %v1136_v21 = vmax.f32 %v1116_v13, %v1125_v24  ;;  %vm2393_vm14 = vmmov %vm2391_vm7 }
 0x416   :  { %v1126_v25 = vsel %vm2391_vm7, %v1546_v18, %v1550_v12  ;;  %v1127_v15 = vsel %vm2392_vm11, %v1545_v27, %v1546_v18  ;;  %v1128_v22 = vsel %vm2393_vm14, %v1551_v11, %v1545_v27  ;;  %vm2397_vm4 = vmmov %vm2394_vm5 }
 0x417   :  { %v1134_v26 = vmax.f32 %v1114_v40, %v1127_v15  ;;  %v1129_v42 = vsel %vm1822_vm8, %v1128_v22, 0.0  ;;  %v1131_v43 = vsel %vm1850_vm6, %v1126_v25, 0.0  ;;  %v1142_v44 = vpack.c.bf16 %v1136_v21, %v1136_v21 }
 0x418   :  { %v1133_v45 = vmax.f32 %v1113_v29, %v1129_v42  ;;  %v1135_v46 = vmax.f32 %v1115_v41, %v1131_v43 }
 0x419   :  { %v1140_v47 = vpack.c.bf16 %v1134_v26, %v1134_v26  ;;  %1299 = vmatprep.subr.msk.bf16.mxu1 %vm2394_vm5, %v1142_v44 }
 0x41a   :  { %v1139_v48 = vpack.c.bf16 %v1133_v45, %v1133_v45  ;;  %v1141_v16 = vpack.c.bf16 %v1135_v46, %v1135_v46 }
 0x41b   :  { %1297 = vmatprep.subr.msk.bf16.mxu0 %vm2395_vm9, %v1140_v47 }
 0x41c   :  { %v1147_v30 = vsel %vm2396_vm15, %v1139_v48, 0  ;;  %v1153_v19 = vsel %vm2397_vm4, %v1141_v16, 0 }
 0x41d   :  { %1159 = vmatpush1.bf16.msra.mxu0 %v1147_v30  ;;  %1200 = vmatpush1.bf16.msra.mxu1 %v1153_v19 }
 0x420   :  { %1298 = vmatmul.mubr.msk.bf16.vlgmr.msra.gmra.mrb[16].mxu0 %vm514_vm1, %v1296_v38  ;;  %1300 = vmatmul.mubr.msk.bf16.vlgmr.msra.gmra.mrb[16].mxu1 %vm514_vm1, %v1296_v38 }
 0x424   :  { %v1248_v59 = vpop.permute.xlu0 %1247 }
 0x455   :  { %v925_v2 = vpop.f32.mrb[12].mxu0  ;;  %v966_v23 = vpop.f32.mrb[12].mxu1 }
 0x456   :  { %v973_v20 = vadd.f32 %v925_v2, %v2176_v8  ;;  %v927_v49 = vpop.f32.mrb[13].mxu0  ;;  %v975_v50 = vadd.f32 %v966_v23, %v2178_v17  ;;  %v968_v52 = vpop.f32.mrb[13].mxu1 }
 0x457   :  { %v974_v51 = vadd.f32 %v927_v49, %v2180_v28  ;;  %v929_v53 = vpop.f32.mrb[14].mxu0  ;;  %v976_v54 = vadd.f32 %v968_v52, %v2182_v39  ;;  %v970_v57 = vpop.f32.mrb[14].mxu1 }
 0x458   :  { %v930_v31 = vpop.f32.mrb[15].mxu0  ;;  %v971_v55 = vpop.f32.mrb[15].mxu1 }
 0x4f3   :  { %v1192_v5 = vpop.f32.mrb[16].mxu0  ;;  %v1233_v6 = vpop.f32.mrb[16].mxu1 }
 0x4f4   :  { %v1240_v58 = vadd.f32 %v1192_v5, %v973_v20  ;;  %v1242_v60 = vadd.f32 %v1233_v6, %v975_v50  ;;  %v1194_v61 = vpop.f32.mrb[17].mxu0  ;;  %v1235_v8 = vpop.f32.mrb[17].mxu1 }
 0x4f5   :  { %v1241_v56 = vadd.f32 %v1194_v61, %v974_v51  ;;  %v1243_v3 = vadd.f32 %v1235_v8, %v976_v54  ;;  %v1196_v37 = vpop.f32.mrb[18].mxu0  ;;  %v1237_v17 = vpop.f32.mrb[18].mxu1 }
 0x4f6   :  { %v1250_v34 = vadd.f32 %v1248_v59, %v1240_v58  ;;  %v1252_v28 = vadd.f32 %v1248_v59, %v1242_v60  ;;  %v1197_v62 = vpop.f32.mrb[19].mxu0  ;;  %v1238_v14 = vpop.f32.mrb[19].mxu1 }
 0x4f7   :  { %v1251_v39 = vadd.f32 %v1248_v59, %v1241_v56  ;;  %v1253_v35 = vadd.f32 %v1248_v59, %v1243_v3 }
 0x4f8   :  { %v1254_v32 = vmax.f32 %v1250_v34, 0.0  ;;  %v1256_v0 = vmax.f32 %v1252_v28, 0.0 }
 0x4f9   :  { %v1255_v36 = vmax.f32 %v1251_v39, 0.0  ;;  %v1257_v4 = vmax.f32 %v1253_v35, 0.0 }
 0x4fa   :  { %1258 = vst [vmem:[#allocation2] sm:$0xff] %v1254_v32  ;;  %1260 = vst [vmem:[#allocation2 + $0x10] sm:$0xff] %v1256_v0 }
 0x4fb   :  { %1259 = vst [vmem:[#allocation2 + $0x8] sm:$0xff] %v1255_v36  ;;  %1261 = vst [vmem:[#allocation2 + $0x18] sm:$0xff] %v1257_v4 }
 0x4fc   :  { %1568 = shalt.err (!%p1565_p4)
}
 0x4fd   :  { %s1569_s14 = scalar_lea.hbm %s2263_s4, 512 }
 0x4fe   :  { %p1570_p5 = scmp.ne.s32.totalorder %s2263_s4, %s1569_s14  ;;  %p1573_p6 = scmp.lt.u32.totalorder %s1569_s14, %s2263_s4 }
 0x500   :  { %p1575_p7 = pnand %p1573_p6, %p1570_p5 }
 0x502   :  { %1578 = shalt.err (!%p1575_p7)
}
 0x503   :  { %1271 = dma.vmem_to_hbm [thread:$0]  %s1269_s10, 512, %s2263_s4, [#allocation3]  }
 0x504   :  { %1579 = dma.done.wait [#allocation3], 512  }
 0x505   :  { %1580 = vsyncadd [#allocation3], 4294966784 }
 0x506   :  { %1275 = vsyncpa [#allocation3], 1 }

</bundles_post_ra>
